<compile_context>
chip_gen: v5e
topology: v5e:2x2
jax: 0.10.0
libtpu: 0.0.40
codegen_flags: <defaults>
</compile_context>

<pallas_src>
import jax
import jax.numpy as jnp
from jax.experimental import pallas as pl
from jax.experimental.pallas import tpu as pltpu


def _interp_matrix(in_size: int, out_size: int) -> jax.Array:
    """(out_size, in_size) bilinear interpolation weights, align_corners=True."""
    if out_size == 1:
        src = jnp.zeros((1,), jnp.float32)
    else:
        src = jnp.arange(out_size, dtype=jnp.float32) * (
            (in_size - 1) / (out_size - 1))
    i0 = jnp.clip(jnp.floor(src), 0, in_size - 1).astype(jnp.int32)
    i1 = jnp.minimum(i0 + 1, in_size - 1)
    frac = src - i0.astype(jnp.float32)
    rows = jnp.arange(out_size)
    mat = jnp.zeros((out_size, in_size), jnp.float32)
    mat = mat.at[rows, i0].add(1.0 - frac)
    mat = mat.at[rows, i1].add(frac)
    return mat


def _split_bf16(a):
    """Split f32 -> (hi, lo) bf16 so that hi + lo ~= a (for 3-pass bf16 matmul)."""
    a = a.astype(jnp.float32)
    hi = a.astype(jnp.bfloat16)
    lo = (a - hi.astype(jnp.float32)).astype(jnp.bfloat16)
    return hi, lo


def _resize_kernel(x_ref, whT_ref, wwt_ref, o_ref, t_ref):
    nb, _, in_w = x_ref.shape
    out_h = whT_ref.shape[1]
    out_w = wwt_ref.shape[1]

    whT = whT_ref[...]                                  # (in_h, out_h)

    # Stage 1: H-resize.  Narrow-M orientation: stream only in_w rows per
    # plane through the MXU, then a cheap XLU transpose into the scratch.
    f32_in = (x_ref.dtype == jnp.float32 and whT_ref.dtype == jnp.float32)
    prec1 = jax.lax.Precision.HIGHEST if f32_in else jax.lax.Precision.DEFAULT

    @pl.loop(0, nb)
    def _(i):
        x_i = x_ref[i]                                  # (in_h, in_w), native dtype
        # u_i[w, p] = sum_h x_i[h, w] * Wh[p, h]
        u_i = jnp.dot(x_i.T, whT, precision=prec1,
                      preferred_element_type=jnp.float32)   # (in_w, out_h)
        t_ref[i] = u_i.T                                # (out_h, in_w) f32

    # Stage 2: W-resize as ONE flattened 2D matmul (M = nb*out_h, K = in_w).
    # Hand-rolled bf16 hi/lo split: 3 native bf16 passes with f32 accumulation
    # (~1e-5 relative error), instead of Precision.HIGHEST's 6 passes.
    t2 = t_ref[...].reshape(nb * out_h, in_w)           # f32
    t_hi, t_lo = _split_bf16(t2)
    w_hi, w_lo = _split_bf16(wwt_ref[...])              # (in_w, out_w)

    y = jnp.dot(t_hi, w_hi, preferred_element_type=jnp.float32)
    y = y + jnp.dot(t_lo, w_hi, preferred_element_type=jnp.float32)
    y = y + jnp.dot(t_hi, w_lo, preferred_element_type=jnp.float32)

    o_ref[...] = y.reshape(nb, out_h, out_w).astype(o_ref.dtype)


def _vmem_capacity_bytes() -> int:
    try:
        info = pltpu.get_tpu_info()
        for name in ("vmem_capacity_bytes", "vmem_size_bytes"):
            cap = getattr(info, name, None)
            if cap:
                return int(cap)
    except Exception:
        pass
    return 64 * 1024 * 1024  # conservative: v7x per-TensorCore VMEM


def _per_plane_vmem_bytes(in_h, in_w, out_h, out_w, itemsize) -> int:
    """Honest per-plane VMEM estimate (lane-padded, incl. temporaries)."""
    lane = lambda d: -(-d // 128) * 128
    sub = lambda d: -(-d // 8) * 8
    x_blk = sub(in_h) * lane(in_w) * itemsize           # input tile (per buffer)
    o_blk = sub(out_h) * lane(out_w) * itemsize         # output tile (per buffer)
    t_blk = sub(out_h) * lane(in_w) * 4                 # f32 scratch
    t_split = sub(out_h) * lane(in_w) * 4               # bf16 hi+lo copies of t
    y_tmp = 2 * sub(out_h) * lane(out_w) * 4            # live f32 partial sums
    return 2 * x_blk + 2 * o_blk + t_blk + t_split + y_tmp


def bilinear_resize(x: jax.Array, out_size) -> jax.Array:
    """Equivalent of F.interpolate(x, size=out_size, mode='bilinear', align_corners=True)."""
    out_h, out_w = int(out_size[0]), int(out_size[1])
    B, C, in_h, in_w = x.shape
    N = B * C

    if not jnp.issubdtype(x.dtype, jnp.floating):
        raise TypeError("bilinear_resize expects a floating-point input")

    # Feed bf16 inputs to the MXU natively (no f32 upcast of x in the kernel).
    w_dtype = jnp.bfloat16 if x.dtype == jnp.bfloat16 else jnp.float32
    whT = _interp_matrix(in_h, out_h).T.astype(w_dtype)   # (in_h, out_h)
    wwt = _interp_matrix(in_w, out_w).T.astype(w_dtype)   # (in_w, out_w)

    # Generation-aware VMEM budget (v5e/v6e: 128 MiB physical, v7x: 64 MiB/TC).
    vmem_cap = _vmem_capacity_bytes()
    vmem_limit = min((vmem_cap * 3) // 4, 96 * 1024 * 1024)
    budget = (vmem_limit * 7) // 10

    per_plane = _per_plane_vmem_bytes(in_h, in_w, out_h, out_w, x.dtype.itemsize)
    nb = max(1, min(N, budget // max(per_plane, 1)))
    # >= 4 grid steps when N allows: both v7x TensorCores get work and the
    # output-writeback pipeline engages.  Trailing block is padded by Pallas.
    nb = min(nb, max(1, pl.cdiv(N, 4)))
    grid = (pl.cdiv(N, nb),)

    x3 = x.reshape(N, in_h, in_w)

    flops = 2 * N * (out_h * in_h * in_w + out_h * in_w * out_w)
    bytes_accessed = (x3.size * x3.dtype.itemsize
                      + N * out_h * out_w * x.dtype.itemsize
                      + whT.size * whT.dtype.itemsize
                      + wwt.size * wwt.dtype.itemsize)

    out3 = pl.pallas_call(
        _resize_kernel,
        out_shape=jax.ShapeDtypeStruct((N, out_h, out_w), x.dtype),
        grid_spec=pltpu.PrefetchScalarGridSpec(
            num_scalar_prefetch=0,
            grid=grid,
            in_specs=[
                pl.BlockSpec((nb, in_h, in_w), lambda n: (n, 0, 0)),
                pl.BlockSpec((in_h, out_h), lambda n: (0, 0)),
                pl.BlockSpec((in_w, out_w), lambda n: (0, 0)),
            ],
            out_specs=pl.BlockSpec((nb, out_h, out_w), lambda n: (n, 0, 0)),
            scratch_shapes=[pltpu.VMEM((nb, out_h, in_w), jnp.float32)],
        ),
        compiler_params=pltpu.CompilerParams(
            # Plane blocks write disjoint output tiles -> shard across both
            # TensorCores on v7x; neutral on v5e/v6e.
            dimension_semantics=("parallel",),
            vmem_limit_bytes=int(vmem_limit),
        ),
        cost_estimate=pl.CostEstimate(
            flops=int(flops), transcendentals=0,
            bytes_accessed=int(bytes_accessed)),
    )(x3, whT, wwt)

    return out3.reshape(B, C, out_h, out_w)


def _reference_bilinear(x, out_h, out_w):
    """Pure-JAX gather-based bilinear, align_corners=True (PyTorch semantics)."""
    _, _, in_h, in_w = x.shape
    ys = (jnp.arange(out_h, dtype=jnp.float32) * ((in_h - 1) / (out_h - 1))
          if out_h > 1 else jnp.zeros((1,), jnp.float32))
    xs = (jnp.arange(out_w, dtype=jnp.float32) * ((in_w - 1) / (out_w - 1))
          if out_w > 1 else jnp.zeros((1,), jnp.float32))
    y0 = jnp.floor(ys).astype(jnp.int32)
    y1 = jnp.minimum(y0 + 1, in_h - 1)
    x0 = jnp.floor(xs).astype(jnp.int32)
    x1 = jnp.minimum(x0 + 1, in_w - 1)
    fy = (ys - y0.astype(jnp.float32))[None, None, :, None]
    fx = (xs - x0.astype(jnp.float32))[None, None, None, :]
    tl = x[:, :, y0][:, :, :, x0]
    tr = x[:, :, y0][:, :, :, x1]
    bl = x[:, :, y1][:, :, :, x0]
    br = x[:, :, y1][:, :, :, x1]
    return (tl * (1 - fy) * (1 - fx) + tr * (1 - fy) * fx
            + bl * fy * (1 - fx) + br * fy * fx)


if __name__ == "__main__":
    key = jax.random.PRNGKey(0)
    # Small NCHW input; output size matches the PyTorch module default [224, 224].
    B, C, H, W = 2, 4, 16, 16
    out_size = (224, 224)
    x = jax.random.normal(key, (B, C, H, W), dtype=jnp.float32)

    out = jax.block_until_ready(bilinear_resize(x, out_size))

    ref = _reference_bilinear(x, *out_size)
    assert out.shape == ref.shape == (B, C, out_size[0], out_size[1])
    max_err = float(jnp.max(jnp.abs(out - ref)))
    assert jnp.allclose(out, ref, atol=1e-4, rtol=1e-4), max_err

    print("KERNEL_OK")
</pallas_src>

<mosaic_0001>
module attributes {stable_mosaic.version = 11 : i64} {
  func.func @_resize_kernel(%arg0: i32, %arg1: memref<2x16x16xf32, #tpu.memory_space<vmem>>, %arg2: memref<16x224xf32, #tpu.memory_space<vmem>>, %arg3: memref<16x224xf32, #tpu.memory_space<vmem>>, %arg4: memref<2x224x224xf32, #tpu.memory_space<vmem>>, %arg5: memref<2x224x16xf32, #tpu.memory_space<vmem>>) attributes {dimension_semantics = [#tpu.dimension_semantics<parallel>], iteration_bounds = array<i64: 4>, scalar_prefetch = 0 : i64, scratch_operands = 1 : i64, tpu.core_type = #tpu.core_type<tc>, window_params = [{transform_indices = @transform_0, window_bounds = array<i64: 2, 16, 16>}, {pipeline_mode = #tpu.pipeline_mode<synchronous>, transform_indices = @transform_1, window_bounds = array<i64: 16, 224>}, {pipeline_mode = #tpu.pipeline_mode<synchronous>, transform_indices = @transform_2, window_bounds = array<i64: 16, 224>}, {transform_indices = @transform_3, window_bounds = array<i64: 2, 224, 224>}]} {
    %c0 = arith.constant 0 : index
    %c0_0 = arith.constant 0 : index
    %0 = vector.load %arg2[%c0, %c0_0] : memref<16x224xf32, #tpu.memory_space<vmem>>, vector<16x224xf32>
    %c0_i32 = arith.constant 0 : i32
    %c2_i32 = arith.constant 2 : i32
    %1 = arith.addi %c0_i32, %c2_i32 : i32
    %c1_i32 = arith.constant 1 : i32
    scf.for %arg6 = %c0_i32 to %1 step %c1_i32  : i32 {
      %c1_i32_12 = arith.constant 1 : i32
      %20 = arith.muli %arg6, %c1_i32_12 : i32
      %c0_i32_13 = arith.constant 0 : i32
      %21 = arith.addi %c0_i32_13, %20 : i32
      %22 = arith.index_cast %21 : i32 to index
      %c0_14 = arith.constant 0 : index
      %c0_15 = arith.constant 0 : index
      %23 = vector.load %arg1[%22, %c0_14, %c0_15] : memref<2x16x16xf32, #tpu.memory_space<vmem>>, vector<1x16x16xf32>
      %24 = vector.shape_cast %23 : vector<1x16x16xf32> to vector<16x16xf32>
      %25 = tpu.transpose %24, [1, 0] : vector<16x16xf32> -> vector<16x16xf32>
      %cst_16 = arith.constant dense<0.000000e+00> : vector<16x224xf32>
      %26 = tpu.matmul %25, %0, %cst_16 {dimension_numbers = #tpu.dot_dimension_numbers<[1], [0], [0], [1], [0, 0, 1, 1], [], []>, precision = #tpu.contract_precision<fp32>} : vector<16x16xf32>, vector<16x224xf32>, vector<16x224xf32> -> vector<16x224xf32>
      %27 = tpu.transpose %26, [1, 0] : vector<16x224xf32> -> vector<224x16xf32>
      %28 = arith.index_cast %21 : i32 to index
      %c0_17 = arith.constant 0 : index
      %c0_18 = arith.constant 0 : index
      %29 = vector.load %arg5[%28, %c0_17, %c0_18] : memref<2x224x16xf32, #tpu.memory_space<vmem>>, vector<1x224x16xf32>
      %30 = vector.shape_cast %29 : vector<1x224x16xf32> to vector<224x16xf32>
      %31 = vector.shape_cast %27 : vector<224x16xf32> to vector<1x224x16xf32>
      tpu.vector_store %arg5[%28, %c0_17, %c0_18], %31 {strides = array<i32>} : memref<2x224x16xf32, #tpu.memory_space<vmem>>, vector<1x224x16xf32>,
    }
    %c2_i32_1 = arith.constant 2 : i32
    %c0_2 = arith.constant 0 : index
    %c0_3 = arith.constant 0 : index
    %c0_4 = arith.constant 0 : index
    %2 = vector.load %arg5[%c0_2, %c0_3, %c0_4] : memref<2x224x16xf32, #tpu.memory_space<vmem>>, vector<2x224x16xf32>
    %3 = vector.shape_cast %2 : vector<2x224x16xf32> to vector<448x16xf32>
    %4 = arith.truncf %3 : vector<448x16xf32> to vector<448x16xbf16>
    %5 = arith.extf %4 : vector<448x16xbf16> to vector<448x16xf32>
    %6 = arith.subf %3, %5 : vector<448x16xf32>
    %7 = arith.truncf %6 : vector<448x16xf32> to vector<448x16xbf16>
    %c0_5 = arith.constant 0 : index
    %c0_6 = arith.constant 0 : index
    %8 = vector.load %arg3[%c0_5, %c0_6] : memref<16x224xf32, #tpu.memory_space<vmem>>, vector<16x224xf32>
    %9 = arith.truncf %8 : vector<16x224xf32> to vector<16x224xbf16>
    %10 = arith.extf %9 : vector<16x224xbf16> to vector<16x224xf32>
    %11 = arith.subf %8, %10 : vector<16x224xf32>
    %12 = arith.truncf %11 : vector<16x224xf32> to vector<16x224xbf16>
    %cst = arith.constant dense<0.000000e+00> : vector<448x224xf32>
    %13 = tpu.matmul %4, %9, %cst {dimension_numbers = #tpu.dot_dimension_numbers<[1], [0], [0], [1], [0, 0, 1, 1], [], []>} : vector<448x16xbf16>, vector<16x224xbf16>, vector<448x224xf32> -> vector<448x224xf32>
    %cst_7 = arith.constant dense<0.000000e+00> : vector<448x224xf32>
    %14 = tpu.matmul %7, %9, %cst_7 {dimension_numbers = #tpu.dot_dimension_numbers<[1], [0], [0], [1], [0, 0, 1, 1], [], []>} : vector<448x16xbf16>, vector<16x224xbf16>, vector<448x224xf32> -> vector<448x224xf32>
    %15 = arith.addf %13, %14 : vector<448x224xf32>
    %cst_8 = arith.constant dense<0.000000e+00> : vector<448x224xf32>
    %16 = tpu.matmul %4, %12, %cst_8 {dimension_numbers = #tpu.dot_dimension_numbers<[1], [0], [0], [1], [0, 0, 1, 1], [], []>} : vector<448x16xbf16>, vector<16x224xbf16>, vector<448x224xf32> -> vector<448x224xf32>
    %17 = arith.addf %15, %16 : vector<448x224xf32>
    %18 = vector.shape_cast %17 : vector<448x224xf32> to vector<2x224x224xf32>
    %c0_9 = arith.constant 0 : index
    %c0_10 = arith.constant 0 : index
    %c0_11 = arith.constant 0 : index
    %19 = vector.load %arg4[%c0_9, %c0_10, %c0_11] : memref<2x224x224xf32, #tpu.memory_space<vmem>>, vector<2x224x224xf32>
    tpu.vector_store %arg4[%c0_9, %c0_10, %c0_11], %18 {strides = array<i32>} : memref<2x224x224xf32, #tpu.memory_space<vmem>>, vector<2x224x224xf32>,
    return
  }
  func.func @transform_0(%arg0: i32) -> (i32, i32, i32) {
    %c0_i32 = arith.constant 0 : i32
    %c0_i32_0 = arith.constant 0 : i32
    %c0_i32_1 = arith.constant 0 : i32
    return %arg0, %c0_i32, %c0_i32_0 : i32, i32, i32
  }
  func.func @transform_1(%arg0: i32) -> (i32, i32) {
    %c0_i32 = arith.constant 0 : i32
    %c0_i32_0 = arith.constant 0 : i32
    %c0_i32_1 = arith.constant 0 : i32
    return %c0_i32, %c0_i32_0 : i32, i32
  }
  func.func @transform_2(%arg0: i32) -> (i32, i32) {
    %c0_i32 = arith.constant 0 : i32
    %c0_i32_0 = arith.constant 0 : i32
    %c0_i32_1 = arith.constant 0 : i32
    return %c0_i32, %c0_i32_0 : i32, i32
  }
  func.func @transform_3(%arg0: i32) -> (i32, i32, i32) {
    %c0_i32 = arith.constant 0 : i32
    %c0_i32_0 = arith.constant 0 : i32
    %c0_i32_1 = arith.constant 0 : i32
    return %arg0, %c0_i32, %c0_i32_0 : i32, i32, i32
  }
}

</mosaic_0001>

<bundles_post_ra>
// kernel: tpu_custom_call.1
= control target key start
LH: loop header
LB: loop body
LE: loop exit
PB: predicated region body
PF: predicated region fallthrough
CT: control target
= control target key end

     0   :  { %8 = vsyncpa [#allocation4], 0  ;;  %s4186_s0 = inlined_call_operand.hbm [shape: f32[8,16,16], index: 0, kind: input, shape index: {}]   ;;  %s4187_s1 = inlined_call_operand.hbm [shape: f32[16,224], index: 1, kind: input, shape index: {}]   ;;  %s4188_s2 = inlined_call_operand.hbm [shape: f32[16,224], index: 2, kind: input, shape index: {}]   ;;  %s4189_s3 = inlined_call_operand.hbm [shape: f32[8,224,224], index: 3, kind: output, shape index: {}]  }
   0x1   :  { %10 = vsyncpa [#allocation4 + $0x1], 0 }
   0x2   :  { %11 = vsyncpa [#allocation7], 0 }
   0x3   :  { %12 = vsyncpa [#allocation5], 0 }
   0x4   :  { %14 = vsyncpa [#allocation5 + $0x1], 0  ;;  %s3052_s12 = smov 0   ;;  %s3054_s13 = smov 0  }
   0x5   :  { %s3056_s14 = smov 0   ;;  %s3058_s15 = smov 0  }
   0x6 LB: > { %s3073_s16 = sadd.s32 4294967295, %s3018_s15   ;;  %s2579_s17 = sadd.s32 4294967294, %s3018_s15   ;;  %s3018_s15 = sphi %s3058_s15, %s4423_s15   ;;  %s3014_s14 = sphi %s3056_s14, %s4422_s14   ;;  %s3010_s13 = sphi %s3054_s13, %s4421_s13   ;;  %s3006_s12 = sphi %s3052_s12, %s4420_s12  }
   0x7   : > { %p40_p0 = scmp.ne.s32.totalorder %s3010_s13, %s3006_s12  ;;  %p41_p1 = scmp.eq.s32.totalorder %s3073_s16, 0 }
   0x8   : > { %p106_p2 = scmp.eq.s32.totalorder %s3073_s16, 3  ;;  %p112_p3 = scmp.eq.s32.totalorder %s2579_s17, 3 }
   0x9   : > { %p3082_p4 = por %p41_p1, %p40_p0  ;;  %p2580_p5 = scmp.ge.s32.totalorder %s3018_s15, 1 }
   0xa   : > { %p3087_p6 = por %p112_p3, %p40_p0  ;;  %p119_p7 = scmp.lt.s32.totalorder %s3018_s15, 5 }
   0xb   : > { %s130_s22 = sshll.u32 %s4187_s1, 4  ;;  %s3024_s24 = smov [#allocation6]   ;;  %s131_s22 = int_to_ptr.hbm [resolvable:$true] %s130_s22 }
   0xc   : > { %p3095_p8 = pnand %p2580_p5, %p119_p7  ;;  %s132_s25 = sshll.u32 %s3024_s24, 4  ;;  %s133_s25 = int_to_ptr.vmem [resolvable:$true] %s132_s25 }
   0xd   : > { %s144_s28 = sshll.u32 %s4188_s2, 4  ;;  %s3025_s29 = smov 256   ;;  %s145_s28 = int_to_ptr.hbm [resolvable:$true] %s144_s28 }
   0xe   : > { %p2784_p9 = pneg %p3095_p8  ;;  %s3026_s30 = smov 16  }
   0xf   : > { %s3027_s4 = smov [#allocation8]   ;;  %s3107_s6 = sadd.s32 1, %s3018_s15  }
  0x10   : > { %p2785_p10 = pnand %p2784_p9, %p41_p1  ;;  %s146_s5 = sshll.u32 %s3027_s4, 4  ;;  %s147_s5 = int_to_ptr.vmem [resolvable:$true] %s146_s5 }
  0x11   : > { %s27_s7 = sadd.s32 1, %s3014_s14  ;;  %s24_s8 = ssub.s32 %s3018_s15, %s3107_s6 }
  0x12   : > { %2787 = dma.hbm_to_vmem [thread:$0]  (!%p2785_p10), %s131_s22, 512, %s133_s25, [#allocation7], %s3025_s29, %s3025_s29, %s3026_s30  }
  0x13   : > { %2790 = dma.hbm_to_vmem [thread:$0]  (!%p2785_p10), %s145_s28, 512, %s147_s5, [#allocation7], %s3025_s29, %s3025_s29, %s3026_s30  }
  0x14   : > { %p34_p11 = scmp.ne.s32.totalorder %s3014_s14, %s3010_s13  ;;  %p25_p12 = scmp.eq.s32.totalorder %s24_s8, 0 }
  0x15   : > { %p35_p13 = scmp.eq.s32.totalorder %s3018_s15, 0  ;;  %p2801_p3 = scmp.lt.s32.totalorder %s3018_s15, 4 }
  0x16   : > { %p3117_p0 = por %p106_p2, %p34_p11  ;;  %s160_s11 = sand.u32 1, %s3014_s14  }
  0x17   : > { %s3123_s10 = scalar_select %p25_p12, %s3014_s14, %s27_s7  }
  0x18   : > { %p36_p5 = por %p35_p13, %p34_p11  ;;  %s2584_s17 = sshll.u32 %s160_s11, 5 }
  0x19   : > { %s2767_s20 = sshll.u32 %s3018_s15, 5  ;;  %s164_s25 = scalar_lea.vmem [#allocation3], %s2584_s17 }
  0x1a   : > { %s170_s24 = scalar_lea.hbm %s4186_s0, %s2767_s20  ;;  %s173_s26 = sshll.u32 %s164_s25, 4  ;;  %s174_s26 = int_to_ptr.vmem [resolvable:$true] %s173_s26 }
  0x1b   : > { %s171_s27 = sshll.u32 %s170_s24, 4  ;;  %p3130_p2 = pnand %p2801_p3, %p36_p5  ;;  %s172_s27 = int_to_ptr.hbm [resolvable:$true] %s171_s27 }
  0x1c   : > { %s161_s29 = scalar_lea.sflag [#allocation4], %s160_s11  ;;  %s2914_s30 = sshra.s32 %s172_s27, 4  ;;  %s2915_s30 = int_to_ptr.hbm [resolvable:$true] %s2914_s30 }
  0x1d   : > { %s2916_s4 = scalar_lea.hbm %s2915_s30, 32  ;;  %p2918_p9 = pneg %p3130_p2 }
  0x1e   : > { %p2917_p7 = scmp.ne.s32.totalorder %s2915_s30, %s2916_s4  ;;  %s2921_s8 = scalar_lea.hbm %s4186_s0, 128 }
  0x1f   : > { %p2922_p12 = scmp.lt.s32.totalorder %s2915_s30, %s4186_s0  ;;  %p2923_p13 = scmp.lt.s32.totalorder %s2921_s8, %s2916_s4 }
  0x20   : > { %p2919_p10 = pnand %p2918_p9, %p2917_p7 }
  0x21   : > { %p2924_p3 = por %p2923_p13, %p2922_p12 }
  0x22   : > { %p2920_p11 = pneg %p2919_p10 }
  0x24   : > { %p2925_p5 = pnand %p2924_p3, %p2920_p11 }
  0x26   : > { %2928 = shalt.err (!%p2925_p5)
}
  0x27   : > { %s3028_s11 = smov 128   ;;  %s3029_s21 = smov 8  }
  0x28   : > { %2794 = dma.hbm_to_vmem [thread:$0]  (!%p3130_p2), %s172_s27, 512, %s174_s26, %s161_s29, %s3028_s11, %s3028_s11, %s3029_s21  }
  0x29   : > { %185 = sbr.rel (%p3095_p8) target bundleno = 1487 (0x5cf), region = 32 }
  0x2e   : > { %s3147_s22 = sand.u32 1, %s3010_s13  }
  0x2f   : > { %s2589_s24 = sshll.u32 %s3147_s22, 5  ;;  %s188_s25 = scalar_lea.sflag [#allocation4], %s3147_s22 }
  0x30   : > { %s3151_s30 = scalar_lea.vmem [#allocation3], %s2589_s24 }
  0x31   : > { %2993 = dma.done.wait (%p3082_p4), %s188_s25, 512  }
  0x32   : > { %2995 = vsyncadd (%p3082_p4), %s188_s25, 4294966784 }
  0x33   : > { %2997 = dma.done.wait (%p41_p1), [#allocation7], 1024  }
  0x34   : > { %2999 = vsyncadd (%p41_p1), [#allocation7], 4294966272  ;;  %s2770_s23 = smul.u32 896, %s3147_s22  ;;  %v3162_v0 = vld [vmem:[#allocation6] sm:$0xff]  ;;  %v3164_v1 = vld [vmem:[#allocation6 + $0x8] sm:$0xff]  ;;  %s3172_s18 = smov 0  }
  0x35   : > { %v3166_v2 = vld [vmem:[#allocation6 + $0x10] sm:$0xff]  ;;  %v3168_v3 = vld [vmem:[#allocation6 + $0x18] sm:$0xff] }
  0x36   : > { %s3170_s26 = scalar_lea.vmem [#allocation9], %s2770_s23 }
  0x37 LB: >> { %s2592_s27 = sshll.u32 %s3022_s18, 4  ;;  %v295_v6 = vand.u32 4294901760, %v3166_v2  ;;  %v297_v8 = vand.u32 4294901760, %v3162_v0  ;;  %v485_v16 = vand.u32 4294901760, %v3168_v3  ;;  %v487_v17 = vand.u32 4294901760, %v3164_v1  ;;  %s725_s29 = smul.u32 224, %s3022_s18  ;;  %s3022_s18 = sphi %s3172_s18, %s237_s18  }
  0x38   : >> { %s239_s28 = scalar_lea.vmem %s3151_s30, %s2592_s27 [#allocation3]  ;;  %vm274_vm0 = vcmask 130048   ;;  %s237_s18 = sadd.s32 1, %s3022_s18  }
  0x39   : >> { %v240_v4 = vld [vmem:[%s239_s28] sm:$0xff]  ;;  %v241_v5 = vld [vmem:[%s239_s28 + $0x8] sm:$0xff]  ;;  %v331_v7 = vsub.f32 %v3166_v2, %v295_v6  ;;  %397 = vmatpush.msra.mxu3 %v295_v6  ;;  %296 = vmatpush.msra.mxu0 %v295_v6  ;;  %v337_v10 = vsub.f32 %v3162_v0, %v297_v8  ;;  %v521_v18 = vsub.f32 %v3168_v3, %v485_v16  ;;  %s3190_s4 = scalar_lea.vmem [#allocation2], %s725_s29  ;;  %p234_p1 = scmp.ge.s32.totalorder %s237_s18, 2  }
  0x3a   : >> { %242 = vxpose.xlu0.b32.start [1/2] (short) (narrow) %v240_v4, 16  ;;  %v527_v20 = vsub.f32 %v3164_v1, %v487_v17  ;;  %vm2349_vm1 = vcmask (%p234_p1), 785408   ;;  %s2771_s5 = smul.u32 (%p234_p1), 896, %s3073_s16  ;;  %s2475_s20 = sshll.u32 (%p234_p1), %s3170_s26, 4  ;;  %s2476_s20 = int_to_ptr.vmem [resolvable:$true] %s2475_s20 }
  0x3b   : >> { %v332_v9 = vand.u32 4294901760, %v331_v7  ;;  %367 = vmatpush.msra.mxu2 %v331_v7  ;;  %399 = vmatpush.msra.mxu3 %v297_v8  ;;  %v338_v12 = vand.u32 4294901760, %v337_v10  ;;  %v522_v19 = vand.u32 4294901760, %v521_v18  ;;  %s2462_s16 = scalar_lea.sflag (%p234_p1), [#allocation5], %s3147_s22  ;;  %s2964_s23 = scalar_lea.hbm (%p234_p1), %s4189_s3, 3584 }
  0x3c   : >> { %298 = vmatpush.msra.mxu0 %v297_v8  ;;  %v528_v22 = vand.u32 4294901760, %v527_v20  ;;  %s2474_s17 = scalar_lea.hbm (%p234_p1), %s4189_s3, %s2771_s5 }
  0x3d   : >> { %v333_v11 = vsub.f32 %v331_v7, %v332_v9  ;;  %370 = vmatpush.msra.mxu2 %v337_v10  ;;  %v339_v14 = vsub.f32 %v337_v10, %v338_v12  ;;  %v523_v21 = vsub.f32 %v521_v18, %v522_v19  ;;  %s2477_s11 = sshll.u32 (%p234_p1), %s2474_s17, 4  ;;  %s2478_s11 = int_to_ptr.hbm [resolvable:$true] %s2477_s11 }
  0x3e   : >> { %430 = vmatpush.msrb.mxu0 %v332_v9  ;;  %v529_v24 = vsub.f32 %v527_v20, %v528_v22  ;;  %s2958_s21 = sshra.s32 (%p234_p1), %s2478_s11, 4  ;;  %s2959_s21 = int_to_ptr.hbm [resolvable:$true] %s2958_s21 }
  0x3f   : >> { %v334_v13 = vand.u32 4294901760, %v333_v11  ;;  %v340_v15 = vand.u32 4294901760, %v339_v14  ;;  %486 = vmatpush.msrb.mxu2 %v485_v16  ;;  %v524_v23 = vand.u32 4294901760, %v523_v21  ;;  %s2960_s24 = scalar_lea.hbm (%p234_p1), %s2959_s21, 896  ;;  %p2965_p7 = scmp.lt.s32.totalorder (%p234_p1), %s2959_s21, %s4189_s3 }
  0x40   : >> { %434 = vmatpush.msrb.mxu0 %v338_v12  ;;  %v530_v25 = vand.u32 4294901760, %v529_v24  ;;  %p2961_p4 = scmp.ne.s32.totalorder (%p234_p1), %s2959_s21, %s2960_s24  ;;  %p2966_p9 = scmp.lt.s32.totalorder (%p234_p1), %s2964_s23, %s2960_s24 }
  0x41   : >> { %335 = vmatpush.msra.mxu1 %v334_v13  ;;  %488 = vmatpush.msrb.mxu2 %v487_v17 }
  0x42   : >> { %243 = vxpose.xlu0.b32.end [2/2] (short) (narrow) %v241_v5, 16  ;;  %525 = vmatpush.msrb.mxu3 %v524_v23  ;;  %p2962_p8 = pnand (%p234_p1), %p2961_p4, %p3117_p0  ;;  %p2967_p10 = por (%p234_p1), %p2966_p9, %p2965_p7 }
  0x43   : >> { %341 = vmatpush.msra.mxu1 %v340_v15 }
  0x44   : >> { %531 = vmatpush.msrb.mxu3 %v530_v25  ;;  %p2963_p2 = pneg (%p234_p1), %p2962_p8 }
  0x45   : >> { %459 = vmatpush.msrb.mxu1 %v295_v6 }
  0x46   : > { %p2968_p11 = pnand (%p234_p1), %p2967_p10, %p2963_p2 }
  0x47   : >> { %461 = vmatpush.msrb.mxu1 %v297_v8 }
  0xde   : >> { %v258_v26 = vpop.trf.xlu0 }
  0xdf   : >> { %v276_v27 = vsel %vm274_vm0, %v258_v26, 0 }
  0xe0   : >> { %v299_v28 = vand.u32 4294901760, %v276_v27 }
  0xe2   : >> { %v300_v29 = vsub.f32 %v276_v27, %v299_v28  ;;  %343 = vmatmul.f32.vlgmr.msra.gmra.mxu1 %v299_v28 }
  0xe3   : >> { %587 = vmatpush.msra.mxu1 %v485_v16 }
  0xe4   : >> { %373 = vmatmul.f32.vlgmr.msra.gmra.mxu2 %v300_v29  ;;  %v301_v30 = vand.u32 4294901760, %v300_v29 }
  0xe5   : >> { %589 = vmatpush.msra.mxu1 %v487_v17  ;;  %620 = vmatpush.msra.mxu2 %v522_v19 }
  0xe6   : >> { %403 = vmatmul.f32.vlgmr.msra.gmra.mxu3 %v301_v30  ;;  %v259_v31 = vpop.trf.xlu0  ;;  %v302_v32 = vsub.f32 %v300_v29, %v301_v30 }
  0xe7   : >> { %v279_v33 = vsel %vm274_vm0, %v259_v31, 0  ;;  %624 = vmatpush.msra.mxu2 %v528_v22  ;;  %649 = vmatpush.msra.mxu3 %v485_v16 }
  0xe8   : >> { %v307_v34 = vand.u32 4294901760, %v279_v33  ;;  %v303_v35 = vand.u32 4294901760, %v302_v32 }
  0xe9   : >> { %651 = vmatpush.msra.mxu3 %v487_v17 }
  0xea   : >> { %v308_v36 = vsub.f32 %v279_v33, %v307_v34  ;;  %304 = vmatmul.f32.vlgmr.msra.gmra.mxu0 %v303_v35  ;;  %347 = vmatmul.f32.gmra.mxu1 %v307_v34 }
  0xeb   : >> { %557 = vmatpush.msra.mxu0 %v521_v18 }
  0xec   : >> { %378 = vmatmul.f32.gmra.mxu2 %v308_v36  ;;  %v309_v37 = vand.u32 4294901760, %v308_v36 }
  0xed   : >> { %560 = vmatpush.msra.mxu0 %v527_v20 }
  0xee   : >> { %409 = vmatmul.f32.gmra.mxu3 %v309_v37  ;;  %v310_v38 = vsub.f32 %v308_v36, %v309_v37 }
  0xf0   : >> { %v311_v39 = vand.u32 4294901760, %v310_v38 }
  0xf2   : >> { %312 = vmatmul.f32.gmra.mxu0 %v311_v39  ;;  %463 = vmatmul.f32.vlgmr.msrb.gmra.mxu1 %v299_v28 }
  0xf4   : >> { %494 = vmatmul.f32.vlgmr.msrb.gmra.mxu2 %v303_v35 }
  0xf6   : >> { %533 = vmatmul.f32.vlgmr.msrb.gmra.mxu3 %v299_v28 }
  0xfa   : >> { %436 = vmatmul.f32.vlgmr.msrb.gmra.mxu0 %v299_v28  ;;  %467 = vmatmul.f32.gmra.mxu1 %v307_v34 }
  0xfc   : >> { %502 = vmatmul.f32.gmra.mxu2 %v311_v39 }
  0xfe   : >> { %537 = vmatmul.f32.gmra.mxu3 %v307_v34 }
 0x102   : >> { %440 = vmatmul.f32.gmra.mxu0 %v307_v34  ;;  %593 = vmatmul.f32.vlgmr.msra.gmra.mxu1 %v301_v30 }
 0x104   : >> { %626 = vmatmul.f32.vlgmr.msra.gmra.mxu2 %v299_v28 }
 0x106   : >> { %653 = vmatmul.f32.vlgmr.msra.gmra.mxu3 %v299_v28 }
 0x10a   : >> { %563 = vmatmul.f32.vlgmr.msra.gmra.mxu0 %v300_v29  ;;  %599 = vmatmul.f32.gmra.mxu1 %v309_v37 }
 0x10c   : >> { %630 = vmatmul.f32.gmra.mxu2 %v307_v34 }
 0x10e   : >> { %657 = vmatmul.f32.gmra.mxu3 %v307_v34 }
 0x112   : >> { %568 = vmatmul.f32.gmra.mxu0 %v308_v36 }
 0x15f   : >> { %v344_v40 = vpop.f32.mrf.mxu1 }
 0x167   : >> { %v305_v41 = vpop.f32.mrf.mxu0  ;;  %v374_v42 = vpop.f32.mrf.mxu2 }
 0x168   : >> { %v348_v43 = vpop.f32.mrf.mxu1  ;;  %v345_v45 = vadd.f32 %v344_v40, %v305_v41 }
 0x169   : >> { %v404_v44 = vpop.f32.mrf.mxu3 }
 0x16a   : >> { %v375_v49 = vadd.f32 %v374_v42, %v345_v45 }
 0x16c   : >> { %v405_v51 = vadd.f32 %v404_v44, %v375_v49 }
 0x16f   : >> { %v313_v46 = vpop.f32.mrf.mxu0  ;;  %v379_v47 = vpop.f32.mrf.mxu2 }
 0x170   : >> { %v464_v50 = vpop.f32.mrf.mxu1  ;;  %v349_v52 = vadd.f32 %v348_v43, %v313_v46 }
 0x171   : >> { %v410_v48 = vpop.f32.mrf.mxu3 }
 0x172   : >> { %v380_v57 = vadd.f32 %v379_v47, %v349_v52  ;;  %v1007_v52 = vld [vmem:[#allocation8] sm:$0xff] (%p234_p1) }
 0x174   : >> { %v411_v60 = vadd.f32 %v410_v48, %v380_v57 }
 0x177   : >> { %v437_v53 = vpop.f32.mrf.mxu0  ;;  %v495_v55 = vpop.f32.mrf.mxu2 }
 0x178   : >> { %v438_v54 = vadd.f32 %v437_v53, %v405_v51  ;;  %v468_v59 = vpop.f32.mrf.mxu1  ;;  %v1008_v53 = vld [vmem:[#allocation8 + $0x8] sm:$0xff] (%p234_p1) }
 0x179   : >> { %v534_v56 = vpop.f32.mrf.mxu3 }
 0x17a   : >> { %v465_v58 = vadd.f32 %v464_v50, %v438_v54  ;;  %v535_v6 = vadd.f32 %v534_v56, %v495_v55  ;;  %v1009_v54 = vld [vmem:[#allocation8 + $0x10] sm:$0xff] (%p234_p1)  ;;  %v1010_v55 = vld [vmem:[#allocation8 + $0x18] sm:$0xff] (%p234_p1)  ;;  %v1011_v56 = vpack.c.bf16 (%p234_p1), %v1008_v53, %v1007_v52 }
 0x17c   : >> { %661 = vxpose.xlu1.b32.start [1/2] (short) %v465_v58, 128 }
 0x17f   : >> { %v441_v61 = vpop.f32.mrf.mxu0  ;;  %v503_v63 = vpop.f32.mrf.mxu2 }
 0x180   : >> { %v442_v62 = vadd.f32 %v441_v61, %v411_v60  ;;  %v594_v7 = vpop.f32.mrf.mxu1 }
 0x181   : >> { %v538_v4 = vpop.f32.mrf.mxu3 }
 0x182   : >> { %v469_v5 = vadd.f32 %v468_v59, %v442_v62  ;;  %v539_v14 = vadd.f32 %v538_v4, %v503_v63  ;;  %v1012_v59 = vpack.c.bf16 (%p234_p1), %v1010_v55, %v1009_v54  ;;  %v1025_v4 = vunpack.c.l.b16 (%p234_p1), %v1011_v56 }
 0x184   : >> { %662 = vxpose.xlu1.b32.end [2/2] (short) %v469_v5, 128  ;;  %v1026_v5 = vunpack.c.h.b16 (%p234_p1), %v1011_v56  ;;  %v1027_v0 = vunpack.c.l.b16 (%p234_p1), %v1012_v59  ;;  %v1028_v1 = vunpack.c.h.b16 (%p234_p1), %v1012_v59 }
 0x187   : >> { %v564_v8 = vpop.f32.mrf.mxu0  ;;  %v627_v10 = vpop.f32.mrf.mxu2 }
 0x188   : >> { %v565_v9 = vadd.f32 %v564_v8, %v535_v6  ;;  %v600_v18 = vpop.f32.mrf.mxu1 }
 0x189   : >> { %v654_v12 = vpop.f32.mrf.mxu3 }
 0x18a   : >> { %v595_v11 = vadd.f32 %v594_v7, %v565_v9 }
 0x18c   : >> { %v628_v13 = vadd.f32 %v627_v10, %v595_v11  ;;  %v1029_v10 = vpack.c.b16 (%p234_p1), %v1027_v0, %v1025_v4  ;;  %v1030_v11 = vpack.c.b16 (%p234_p1), %v1028_v1, %v1026_v5 }
 0x18e   : >> { %v655_v15 = vadd.f32 %v654_v12, %v628_v13  ;;  %1125 = vmatpush.bf16.msra.mxu0 (%p234_p1), %v1029_v10  ;;  %2768 = vmatpush.bf16.msra.mxu2 (%p234_p1), %v1029_v10 }
 0x18f   : >> { %v569_v16 = vpop.f32.mrf.mxu0  ;;  %v631_v20 = vpop.f32.mrf.mxu2  ;;  %1274 = vmatpush.bf16.msra.mxu1 (%p234_p1), %v1030_v11  ;;  %2769 = vmatpush.bf16.msra.mxu3 (%p234_p1), %v1030_v11 }
 0x190   : >> { %v570_v17 = vadd.f32 %v569_v16, %v539_v14  ;;  %693 = vxpose.xlu2.b32.start [1/2] (short) (narrow) %v655_v15, 96 }
 0x191   : >> { %v658_v22 = vpop.f32.mrf.mxu3 }
 0x192   : >> { %v601_v19 = vadd.f32 %v600_v18, %v570_v17  ;;  %v1013_v17 = vunpack.c.l.bf16 (%p234_p1), %v1011_v56  ;;  %v1015_v18 = vunpack.c.l.bf16 (%p234_p1), %v1012_v59  ;;  %1647 = vmatpush.bf16.msrb.mxu2 (%p234_p1), %v1029_v10 }
 0x193   : > { %1796 = vmatpush.bf16.msrb.mxu3 (%p234_p1), %v1030_v11 }
 0x194   : >> { %v632_v21 = vadd.f32 %v631_v20, %v601_v19  ;;  %v1014_v19 = vunpack.c.h.bf16 (%p234_p1), %v1011_v56 }
 0x196   : >> { %v659_v23 = vadd.f32 %v658_v22, %v632_v21 }
 0x198   : >> { %694 = vxpose.xlu2.b32.end [2/2] (short) (narrow) %v659_v23, 96  ;;  %v1016_v23 = vunpack.c.h.bf16 (%p234_p1), %v1012_v59 }
 0x220   : >> { %v677_v24 = vpop.trf.xlu1 }
 0x221   : >> { %727 = vst.msk [vmem:[%s3190_s4] sm:$0xff] %vm274_vm0, %v677_v24 }
 0x228   : >> { %v678_v25 = vpop.trf.xlu1 }
 0x229   : >> { %728 = vst.msk [vmem:[%s3190_s4 + $0x8] sm:$0xff] %vm274_vm0, %v678_v25  ;;  %v709_v26 = vpop.trf.xlu2 }
 0x22a   : >> { %743 = vst.msk [vmem:[%s3190_s4 + $0x80] sm:$0xff] %vm274_vm0, %v709_v26  ;;  %v1017_v26 = vsub.f32 (%p234_p1), %v1007_v52, %v1013_v17 }
 0x230   : >> { %v679_v27 = vpop.trf.xlu1 }
 0x231   : >> { %729 = vst.msk [vmem:[%s3190_s4 + $0x10] sm:$0xff] %vm274_vm0, %v679_v27  ;;  %v710_v28 = vpop.trf.xlu2  ;;  %v1019_v27 = vsub.f32 (%p234_p1), %v1009_v54, %v1015_v18 }
 0x232   : >> { %744 = vst.msk [vmem:[%s3190_s4 + $0x88] sm:$0xff] %vm274_vm0, %v710_v28  ;;  %v1018_v28 = vsub.f32 (%p234_p1), %v1008_v53, %v1014_v19 }
 0x238   : >> { %v680_v29 = vpop.trf.xlu1 }
 0x239   : >> { %730 = vst.msk [vmem:[%s3190_s4 + $0x18] sm:$0xff] %vm274_vm0, %v680_v29  ;;  %v711_v30 = vpop.trf.xlu2  ;;  %v1020_v29 = vsub.f32 (%p234_p1), %v1010_v55, %v1016_v23 }
 0x23a   : >> { %745 = vst.msk [vmem:[%s3190_s4 + $0x90] sm:$0xff] %vm274_vm0, %v711_v30 }
 0x240   : >> { %v681_v31 = vpop.trf.xlu1 }
 0x241   : >> { %731 = vst.msk [vmem:[%s3190_s4 + $0x20] sm:$0xff] %vm274_vm0, %v681_v31  ;;  %v712_v32 = vpop.trf.xlu2 }
 0x242   : >> { %746 = vst.msk [vmem:[%s3190_s4 + $0x98] sm:$0xff] %vm274_vm0, %v712_v32  ;;  %v1021_v32 = vpack.c.bf16 (%p234_p1), %v1019_v27, %v1017_v26 }
 0x244   : > { %1945 = vmatpush.bf16.msrb.mxu0 (%p234_p1), %v1021_v32 }
 0x248   : >> { %v682_v33 = vpop.trf.xlu1 }
 0x249   : >> { %732 = vst.msk [vmem:[%s3190_s4 + $0x28] sm:$0xff] %vm274_vm0, %v682_v33  ;;  %v713_v34 = vpop.trf.xlu2 }
 0x24a   : >> { %747 = vst.msk [vmem:[%s3190_s4 + $0xa0] sm:$0xff] %vm274_vm0, %v713_v34 }
 0x250   : >> { %v683_v35 = vpop.trf.xlu1 }
 0x251   : >> { %733 = vst.msk [vmem:[%s3190_s4 + $0x30] sm:$0xff] %vm274_vm0, %v683_v35  ;;  %v714_v36 = vpop.trf.xlu2  ;;  %v1022_v35 = vpack.c.bf16 (%p234_p1), %v1020_v29, %v1018_v28 }
 0x252   : >> { %748 = vst.msk [vmem:[%s3190_s4 + $0xa8] sm:$0xff] %vm274_vm0, %v714_v36 }
 0x253   : > { %2094 = vmatpush.bf16.msrb.mxu1 (%p234_p1), %v1022_v35 }
 0x258   : >> { %v684_v37 = vpop.trf.xlu1 }
 0x259   : >> { %734 = vst.msk [vmem:[%s3190_s4 + $0x38] sm:$0xff] %vm274_vm0, %v684_v37  ;;  %v715_v38 = vpop.trf.xlu2 }
 0x25a   : >> { %749 = vst.msk [vmem:[%s3190_s4 + $0xb0] sm:$0xff] %vm274_vm0, %v715_v38 }
 0x260   : >> { %v685_v39 = vpop.trf.xlu1 }
 0x261   : >> { %735 = vst.msk [vmem:[%s3190_s4 + $0x40] sm:$0xff] %vm274_vm0, %v685_v39  ;;  %v716_v40 = vpop.trf.xlu2 }
 0x262   : >> { %750 = vst.msk [vmem:[%s3190_s4 + $0xb8] sm:$0xff] %vm274_vm0, %v716_v40 }
 0x268   : >> { %v686_v41 = vpop.trf.xlu1 }
 0x269   : >> { %736 = vst.msk [vmem:[%s3190_s4 + $0x48] sm:$0xff] %vm274_vm0, %v686_v41  ;;  %v717_v42 = vpop.trf.xlu2 }
 0x26a   : >> { %751 = vst.msk [vmem:[%s3190_s4 + $0xc0] sm:$0xff] %vm274_vm0, %v717_v42 }
 0x270   : >> { %v687_v43 = vpop.trf.xlu1 }
 0x271   : >> { %737 = vst.msk [vmem:[%s3190_s4 + $0x50] sm:$0xff] %vm274_vm0, %v687_v43  ;;  %v718_v44 = vpop.trf.xlu2 }
 0x272   : >> { %752 = vst.msk [vmem:[%s3190_s4 + $0xc8] sm:$0xff] %vm274_vm0, %v718_v44 }
 0x278   : >> { %v688_v45 = vpop.trf.xlu1 }
 0x279   : >> { %738 = vst.msk [vmem:[%s3190_s4 + $0x58] sm:$0xff] %vm274_vm0, %v688_v45  ;;  %v719_v46 = vpop.trf.xlu2 }
 0x27a   : >> { %753 = vst.msk [vmem:[%s3190_s4 + $0xd0] sm:$0xff] %vm274_vm0, %v719_v46 }
 0x280   : >> { %v689_v47 = vpop.trf.xlu1 }
 0x281   : >> { %739 = vst.msk [vmem:[%s3190_s4 + $0x60] sm:$0xff] %vm274_vm0, %v689_v47  ;;  %v720_v48 = vpop.trf.xlu2 }
 0x282   : >> { %754 = vst.msk [vmem:[%s3190_s4 + $0xd8] sm:$0xff] %vm274_vm0, %v720_v48 }
 0x288   : >> { %v690_v49 = vpop.trf.xlu1 }
 0x289   : >> { %740 = vst.msk [vmem:[%s3190_s4 + $0x68] sm:$0xff] %vm274_vm0, %v690_v49 }
 0x290   : >> { %v691_v50 = vpop.trf.xlu1 }
 0x291   : >> { %741 = vst.msk [vmem:[%s3190_s4 + $0x70] sm:$0xff] %vm274_vm0, %v691_v50 }
 0x295   : > { %236 = sbr.rel (!%p234_p1) target bundleno = 55 (0x37), region = 94 }
 0x298   : >> { %v692_v51 = vpop.trf.xlu1 }
 0x299   : >> { %742 = vst.msk [vmem:[%s3190_s4 + $0x78] sm:$0xff] %vm274_vm0, %v692_v51 }
 0x2a0   : > { %v755_v57 = vld [vmem:[#allocation2] sm:$0xff]  ;;  %v756_v58 = vld [vmem:[#allocation2 + $0x8] sm:$0xff]  ;;  %v757_v20 = vld [vmem:[#allocation2 + $0x10] sm:$0xff] }
 0x2a1   : > { %v3251_v60 = vpack.c.bf16 %v755_v57, %v755_v57  ;;  %v3253_v61 = vpack.c.bf16 %v756_v58, %v756_v58  ;;  %v783_v62 = vld [vmem:[#allocation2 + $0xe0] sm:$0xff]  ;;  %v784_v63 = vld [vmem:[#allocation2 + $0xe8] sm:$0xff]  ;;  %v758_v21 = vld [vmem:[#allocation2 + $0x18] sm:$0xff]  ;;  %v3265_v30 = vpack.c.bf16 %v757_v20, %v757_v20 }
 0x2a2   : > { %v3255_v6 = vpack.c.bf16 %v783_v62, %v783_v62  ;;  %v3257_v7 = vpack.c.bf16 %v784_v63, %v784_v63  ;;  %v785_v24 = vld [vmem:[#allocation2 + $0xf0] sm:$0xff]  ;;  %v786_v25 = vld [vmem:[#allocation2 + $0xf8] sm:$0xff]  ;;  %v3267_v31 = vpack.c.bf16 %v758_v21, %v758_v21  ;;  %v759_v46 = vld [vmem:[#allocation2 + $0x20] sm:$0xff] }
 0x2a3   : > { %v867_v2 = vunpack.c.l.bf16 %v3251_v60  ;;  %v868_v3 = vunpack.c.l.bf16 %v3253_v61  ;;  %v3271_v33 = vpack.c.bf16 %v785_v24, %v785_v24  ;;  %v3273_v34 = vpack.c.bf16 %v786_v25, %v786_v25  ;;  %v760_v47 = vld [vmem:[#allocation2 + $0x28] sm:$0xff]  ;;  %v787_v48 = vld [vmem:[#allocation2 + $0x100] sm:$0xff]  ;;  %v761_v0 = vld [vmem:[#allocation2 + $0x30] sm:$0xff] }
 0x2a4   : > { %4224 = vst [vmem:[#allocation13_spill] sm:$0xff] %v3257_v7  ;;  %v895_v8 = vunpack.c.l.bf16 %v3255_v6  ;;  %v896_v9 = vunpack.c.l.bf16 %v3257_v7  ;;  %v869_v36 = vunpack.c.l.bf16 %v3265_v30  ;;  %v870_v37 = vunpack.c.l.bf16 %v3267_v31  ;;  %v788_v49 = vld [vmem:[#allocation2 + $0x108] sm:$0xff]  ;;  %v762_v1 = vld [vmem:[#allocation2 + $0x38] sm:$0xff]  ;;  %v809_v7 = vld [vmem:[#allocation2 + $0x1b0] sm:$0xff] }
 0x2a5   : > { %v923_v12 = vsub.f32 %v755_v57, %v867_v2  ;;  %v924_v13 = vsub.f32 %v756_v58, %v868_v3  ;;  %4225 = vst [vmem:[#allocation14_spill] sm:$0xff] %v3271_v33  ;;  %v897_v38 = vunpack.c.l.bf16 %v3271_v33  ;;  %v898_v39 = vunpack.c.l.bf16 %v3273_v34  ;;  %v789_v2 = vld [vmem:[#allocation2 + $0x110] sm:$0xff]  ;;  %v790_v3 = vld [vmem:[#allocation2 + $0x118] sm:$0xff]  ;;  %v764_v23 = vld [vmem:[#allocation2 + $0x48] sm:$0xff] }
 0x2a6   : > { %v951_v14 = vsub.f32 %v783_v62, %v895_v8  ;;  %v952_v15 = vsub.f32 %v784_v63, %v896_v9  ;;  %4226 = vst [vmem:[#allocation15_spill] sm:$0xff] %v3273_v34  ;;  %v925_v40 = vsub.f32 %v757_v20, %v869_v36  ;;  %v926_v41 = vsub.f32 %v758_v21, %v870_v37  ;;  %v781_v33 = vld [vmem:[#allocation2 + $0xd0] sm:$0xff] }
 0x2a7   : > { %v979_v16 = vpack.c.bf16 %v924_v13, %v923_v12  ;;  %v953_v42 = vsub.f32 %v785_v24, %v897_v38  ;;  %v954_v43 = vsub.f32 %v786_v25, %v898_v39  ;;  %v3279_v50 = vpack.c.bf16 %v759_v46, %v759_v46  ;;  %v791_v24 = vld [vmem:[#allocation2 + $0x120] sm:$0xff]  ;;  %v792_v25 = vld [vmem:[#allocation2 + $0x128] sm:$0xff] }
 0x2a8   : > { %v993_v22 = vpack.c.bf16 %v952_v15, %v951_v14  ;;  %v980_v44 = vpack.c.bf16 %v926_v41, %v925_v40  ;;  %v3283_v51 = vpack.c.bf16 %v760_v47, %v760_v47  ;;  %v3285_v52 = vpack.c.bf16 %v787_v48, %v787_v48 }
 0x2a9   : > { %2593 = vmatmul.msk.bf16.vlgmr.msra.gmra.mxu0 %vm274_vm0, %v979_v16  ;;  %2621 = vmatmul.msk.bf16.vlgmr.msra.gmra.mxu1 %vm274_vm0, %v979_v16  ;;  %v994_v45 = vpack.c.bf16 %v954_v43, %v953_v42  ;;  %v3287_v53 = vpack.c.bf16 %v788_v49, %v788_v49  ;;  %v871_v54 = vunpack.c.l.bf16 %v3279_v50  ;;  %v3295_v8 = vpack.c.bf16 %v761_v0, %v761_v0 }
 0x2aa   : > { %2607 = vmatmul.msk.bf16.vlgmr.msra.gmra.mxu2 %vm274_vm0, %v993_v22  ;;  %2635 = vmatmul.msk.bf16.vlgmr.msra.gmra.mxu3 %vm274_vm0, %v993_v22  ;;  %4227 = vst [vmem:[#allocation16_spill] sm:$0xff] %v3285_v52  ;;  %v872_v55 = vunpack.c.l.bf16 %v3283_v51  ;;  %v899_v56 = vunpack.c.l.bf16 %v3285_v52  ;;  %v3299_v9 = vpack.c.bf16 %v762_v1, %v762_v1  ;;  %v3301_v10 = vpack.c.bf16 %v789_v2, %v789_v2  ;;  %v763_v22 = vld [vmem:[#allocation2 + $0x40] sm:$0xff] }
 0x2ab   : > { %4228 = vst [vmem:[#allocation17_spill] sm:$0xff] %v3287_v53  ;;  %v900_v57 = vunpack.c.l.bf16 %v3287_v53  ;;  %v927_v58 = vsub.f32 %v759_v46, %v871_v54  ;;  %v3303_v11 = vpack.c.bf16 %v790_v3, %v790_v3  ;;  %v873_v12 = vunpack.c.l.bf16 %v3295_v8  ;;  %v793_v46 = vld [vmem:[#allocation2 + $0x130] sm:$0xff] }
 0x2ac   : > { %v928_v59 = vsub.f32 %v760_v47, %v872_v55  ;;  %v955_v62 = vsub.f32 %v787_v48, %v899_v56  ;;  %4229 = vst [vmem:[#allocation18_spill] sm:$0xff] %v3301_v10  ;;  %v874_v13 = vunpack.c.l.bf16 %v3299_v9  ;;  %v901_v14 = vunpack.c.l.bf16 %v3301_v10  ;;  %v794_v47 = vld [vmem:[#allocation2 + $0x138] sm:$0xff] }
 0x2ad   : > { %v956_v63 = vsub.f32 %v788_v49, %v900_v57  ;;  %4230 = vst [vmem:[#allocation19_spill] sm:$0xff] %v3303_v11  ;;  %v902_v15 = vunpack.c.l.bf16 %v3303_v11  ;;  %v929_v16 = vsub.f32 %v761_v0, %v873_v12  ;;  %v3311_v26 = vpack.c.bf16 %v763_v22, %v763_v22  ;;  %v795_v12 = vld [vmem:[#allocation2 + $0x140] sm:$0xff] }
 0x2ae   : > { %v981_v4 = vpack.c.bf16 %v928_v59, %v927_v58  ;;  %v930_v17 = vsub.f32 %v762_v1, %v874_v13  ;;  %v957_v18 = vsub.f32 %v789_v2, %v901_v14  ;;  %v3315_v27 = vpack.c.bf16 %v764_v23, %v764_v23  ;;  %v767_v2 = vld [vmem:[#allocation2 + $0x60] sm:$0xff]  ;;  %v796_v13 = vld [vmem:[#allocation2 + $0x148] sm:$0xff] }
 0x2af   : > { %v995_v5 = vpack.c.bf16 %v956_v63, %v955_v62  ;;  %v958_v19 = vsub.f32 %v790_v3, %v902_v15  ;;  %v3317_v28 = vpack.c.bf16 %v791_v24, %v791_v24  ;;  %v3319_v29 = vpack.c.bf16 %v792_v25, %v792_v25  ;;  %v768_v3 = vld [vmem:[#allocation2 + $0x68] sm:$0xff]  ;;  %v807_v11 = vld [vmem:[#allocation2 + $0x1a0] sm:$0xff] }
 0x2b0   : > { %v982_v20 = vpack.c.bf16 %v930_v17, %v929_v16  ;;  %v875_v32 = vunpack.c.l.bf16 %v3311_v26  ;;  %v876_v35 = vunpack.c.l.bf16 %v3315_v27  ;;  %v3333_v54 = vpack.c.bf16 %v793_v46, %v793_v46 }
 0x2b1   : > { %v996_v21 = vpack.c.bf16 %v958_v19, %v957_v18  ;;  %4231 = vst [vmem:[#allocation20_spill] sm:$0xff] %v3317_v28  ;;  %v903_v36 = vunpack.c.l.bf16 %v3317_v28  ;;  %v904_v37 = vunpack.c.l.bf16 %v3319_v29  ;;  %v3335_v55 = vpack.c.bf16 %v794_v47, %v794_v47 }
 0x2b2   : > { %4232 = vst [vmem:[#allocation21_spill] sm:$0xff] %v3319_v29  ;;  %v931_v38 = vsub.f32 %v763_v22, %v875_v32  ;;  %v932_v39 = vsub.f32 %v764_v23, %v876_v35  ;;  %v905_v58 = vunpack.c.l.bf16 %v3333_v54  ;;  %v3343_v14 = vpack.c.bf16 %v767_v2, %v767_v2  ;;  %v779_v29 = vld [vmem:[#allocation2 + $0xc0] sm:$0xff] }
 0x2b3   : > { %v959_v40 = vsub.f32 %v791_v24, %v903_v36  ;;  %v960_v41 = vsub.f32 %v792_v25, %v904_v37  ;;  %4233 = vst [vmem:[#allocation22_spill] sm:$0xff] %v3333_v54  ;;  %v906_v59 = vunpack.c.l.bf16 %v3335_v55  ;;  %v3347_v15 = vpack.c.bf16 %v768_v3, %v768_v3  ;;  %v769_v36 = vld [vmem:[#allocation2 + $0x70] sm:$0xff]  ;;  %v770_v37 = vld [vmem:[#allocation2 + $0x78] sm:$0xff] }
 0x2b4   : > { %v983_v42 = vpack.c.bf16 %v932_v39, %v931_v38  ;;  %4234 = vst [vmem:[#allocation23_spill] sm:$0xff] %v3335_v55  ;;  %v3349_v16 = vpack.c.bf16 %v795_v12, %v795_v12  ;;  %v3351_v17 = vpack.c.bf16 %v796_v13, %v796_v13  ;;  %v879_v18 = vunpack.c.l.bf16 %v3343_v14  ;;  %v797_v38 = vld [vmem:[#allocation2 + $0x150] sm:$0xff]  ;;  %v798_v39 = vld [vmem:[#allocation2 + $0x158] sm:$0xff] }
 0x2b5   : > { %v997_v43 = vpack.c.bf16 %v960_v41, %v959_v40  ;;  %v880_v19 = vunpack.c.l.bf16 %v3347_v15  ;;  %v3359_v40 = vpack.c.bf16 %v769_v36, %v769_v36  ;;  %v3363_v41 = vpack.c.bf16 %v770_v37, %v770_v37 }
 0x2b6   : > { %4235 = vst [vmem:[#allocation24_spill] sm:$0xff] %v3349_v16  ;;  %v935_v22 = vsub.f32 %v767_v2, %v879_v18  ;;  %v3491_v53 = vpack.c.bf16 %v779_v29, %v779_v29 }
 0x2b7   : > { %4236 = vst [vmem:[#allocation25_spill] sm:$0xff] %v3351_v17  ;;  %v936_v23 = vsub.f32 %v768_v3, %v880_v19 }
 0x2b9   : > { %2594 = vmatmul.msk.bf16.gmra.mxu0 %vm274_vm0, %v980_v44  ;;  %2622 = vmatmul.msk.bf16.gmra.mxu1 %vm274_vm0, %v980_v44  ;;  %v765_v44 = vld [vmem:[#allocation2 + $0x50] sm:$0xff]  ;;  %v985_v32 = vpack.c.bf16 %v936_v23, %v935_v22 }
 0x2ba   : > { %2608 = vmatmul.msk.bf16.gmra.mxu2 %vm274_vm0, %v994_v45  ;;  %2636 = vmatmul.msk.bf16.gmra.mxu3 %vm274_vm0, %v994_v45  ;;  %v766_v45 = vld [vmem:[#allocation2 + $0x58] sm:$0xff]  ;;  %v3327_v48 = vpack.c.bf16 %v765_v44, %v765_v44 }
 0x2bb   : > { %v3331_v49 = vpack.c.bf16 %v766_v45, %v766_v45 }
 0x2bc   : > { %v877_v56 = vunpack.c.l.bf16 %v3327_v48 }
 0x2bd   : > { %v878_v57 = vunpack.c.l.bf16 %v3331_v49 }
 0x2be   : > { %v933_v62 = vsub.f32 %v765_v44, %v877_v56  ;;  %v881_v44 = vunpack.c.l.bf16 %v3359_v40 }
 0x2bf   : > { %v934_v63 = vsub.f32 %v766_v45, %v878_v57  ;;  %v882_v45 = vunpack.c.l.bf16 %v3363_v41 }
 0x2c0   : > { %v937_v56 = vsub.f32 %v769_v36, %v881_v44  ;;  %v773_v36 = vld [vmem:[#allocation2 + $0x90] sm:$0xff]  ;;  %v802_v44 = vld [vmem:[#allocation2 + $0x178] sm:$0xff] }
 0x2c1   : > { %v984_v0 = vpack.c.bf16 %v934_v63, %v933_v62  ;;  %v938_v57 = vsub.f32 %v770_v37, %v882_v45 }
 0x2c3   : > { %v986_v62 = vpack.c.bf16 %v938_v57, %v937_v56  ;;  %v3403_v57 = vpack.c.bf16 %v802_v44, %v802_v44 }
 0x2c5   : > { %4242 = vst [vmem:[#allocation31_spill] sm:$0xff] %v3403_v57 }
 0x2c9   : > { %2595 = vmatmul.msk.bf16.gmra.mxu0 %vm274_vm0, %v981_v4  ;;  %2623 = vmatmul.msk.bf16.gmra.mxu1 %vm274_vm0, %v981_v4  ;;  %v961_v4 = vsub.f32 %v793_v46, %v905_v58 }
 0x2ca   : > { %2609 = vmatmul.msk.bf16.gmra.mxu2 %vm274_vm0, %v995_v5  ;;  %2637 = vmatmul.msk.bf16.gmra.mxu3 %vm274_vm0, %v995_v5  ;;  %v962_v5 = vsub.f32 %v794_v47, %v906_v59 }
 0x2cc   : > { %v998_v1 = vpack.c.bf16 %v962_v5, %v961_v4  ;;  %v771_v4 = vld [vmem:[#allocation2 + $0x80] sm:$0xff]  ;;  %v772_v5 = vld [vmem:[#allocation2 + $0x88] sm:$0xff] }
 0x2cd   : > { %v3375_v2 = vpack.c.bf16 %v771_v4, %v771_v4  ;;  %v3379_v3 = vpack.c.bf16 %v772_v5, %v772_v5 }
 0x2cf   : > { %v883_v18 = vunpack.c.l.bf16 %v3375_v2  ;;  %v884_v19 = vunpack.c.l.bf16 %v3379_v3 }
 0x2d1   : > { %v939_v22 = vsub.f32 %v771_v4, %v883_v18  ;;  %v940_v23 = vsub.f32 %v772_v5, %v884_v19  ;;  %v914_v5 = vunpack.c.l.bf16 %v3403_v57  ;;  %v804_v57 = vld [vmem:[#allocation2 + $0x188] sm:$0xff] }
 0x2d9   : > { %2596 = vmatmul.msk.bf16.gmra.mxu0 %vm274_vm0, %v982_v20  ;;  %2624 = vmatmul.msk.bf16.gmra.mxu1 %vm274_vm0, %v982_v20  ;;  %v907_v20 = vunpack.c.l.bf16 %v3349_v16 }
 0x2da   : > { %2610 = vmatmul.msk.bf16.gmra.mxu2 %vm274_vm0, %v996_v21  ;;  %2638 = vmatmul.msk.bf16.gmra.mxu3 %vm274_vm0, %v996_v21  ;;  %v908_v21 = vunpack.c.l.bf16 %v3351_v17  ;;  %v805_v17 = vld [vmem:[#allocation2 + $0x190] sm:$0xff] }
 0x2db   : > { %v963_v24 = vsub.f32 %v795_v12, %v907_v20 }
 0x2dc   : > { %v964_v25 = vsub.f32 %v796_v13, %v908_v21 }
 0x2de   : > { %v999_v35 = vpack.c.bf16 %v964_v25, %v963_v24 }
 0x2e9   : > { %2597 = vmatmul.msk.bf16.gmra.mxu0 %vm274_vm0, %v983_v42  ;;  %2625 = vmatmul.msk.bf16.gmra.mxu1 %vm274_vm0, %v983_v42  ;;  %v3365_v42 = vpack.c.bf16 %v797_v38, %v797_v38 }
 0x2ea   : > { %2611 = vmatmul.msk.bf16.gmra.mxu2 %vm274_vm0, %v997_v43  ;;  %2639 = vmatmul.msk.bf16.gmra.mxu3 %vm274_vm0, %v997_v43  ;;  %v3367_v43 = vpack.c.bf16 %v798_v39, %v798_v39 }
 0x2eb   : > { %4237 = vst [vmem:[#allocation26_spill] sm:$0xff] %v3365_v42  ;;  %v909_v46 = vunpack.c.l.bf16 %v3365_v42 }
 0x2ec   : > { %4238 = vst [vmem:[#allocation27_spill] sm:$0xff] %v3367_v43  ;;  %v910_v47 = vunpack.c.l.bf16 %v3367_v43  ;;  %v777_v43 = vld [vmem:[#allocation2 + $0xb0] sm:$0xff] }
 0x2ed   : > { %v965_v58 = vsub.f32 %v797_v38, %v909_v46  ;;  %v774_v38 = vld [vmem:[#allocation2 + $0x98] sm:$0xff]  ;;  %v3395_v46 = vpack.c.bf16 %v773_v36, %v773_v36  ;;  %v3459_v55 = vpack.c.bf16 %v777_v43, %v777_v43 }
 0x2ee   : > { %v966_v59 = vsub.f32 %v798_v39, %v910_v47  ;;  %v801_v39 = vld [vmem:[#allocation2 + $0x170] sm:$0xff]  ;;  %v3399_v47 = vpack.c.bf16 %v774_v38, %v774_v38 }
 0x2ef   : > { %v3401_v56 = vpack.c.bf16 %v801_v39, %v801_v39 }
 0x2f0   : > { %v1000_v63 = vpack.c.bf16 %v966_v59, %v965_v58 }
 0x2f1   : > { %4241 = vst [vmem:[#allocation30_spill] sm:$0xff] %v3401_v56  ;;  %v913_v4 = vunpack.c.l.bf16 %v3401_v56 }
 0x2f9   : > { %2598 = vmatmul.msk.bf16.gmra.mxu0 %vm274_vm0, %v984_v0  ;;  %2626 = vmatmul.msk.bf16.gmra.mxu1 %vm274_vm0, %v984_v0  ;;  %v799_v0 = vld [vmem:[#allocation2 + $0x160] sm:$0xff] }
 0x2fa   : > { %2612 = vmatmul.msk.bf16.gmra.mxu2 %vm274_vm0, %v998_v1  ;;  %2640 = vmatmul.msk.bf16.gmra.mxu3 %vm274_vm0, %v998_v1  ;;  %v800_v1 = vld [vmem:[#allocation2 + $0x168] sm:$0xff]  ;;  %v3381_v12 = vpack.c.bf16 %v799_v0, %v799_v0 }
 0x2fb   : > { %v3383_v13 = vpack.c.bf16 %v800_v1, %v800_v1 }
 0x2fc   : > { %4239 = vst [vmem:[#allocation28_spill] sm:$0xff] %v3381_v12  ;;  %v911_v20 = vunpack.c.l.bf16 %v3381_v12 }
 0x2fd   : > { %4240 = vst [vmem:[#allocation29_spill] sm:$0xff] %v3383_v13  ;;  %v912_v21 = vunpack.c.l.bf16 %v3383_v13 }
 0x2fe   : > { %v967_v24 = vsub.f32 %v799_v0, %v911_v20  ;;  %v969_v20 = vsub.f32 %v801_v39, %v913_v4  ;;  %v3435_v39 = vpack.c.bf16 %v804_v57, %v804_v57 }
 0x2ff   : > { %v968_v25 = vsub.f32 %v800_v1, %v912_v21  ;;  %v970_v21 = vsub.f32 %v802_v44, %v914_v5 }
 0x300   : > { %4248 = vst [vmem:[#allocation37_spill] sm:$0xff] %v3435_v39 }
 0x309   : > { %2599 = vmatmul.msk.bf16.gmra.mxu0 %vm274_vm0, %v985_v32  ;;  %2627 = vmatmul.msk.bf16.gmra.mxu1 %vm274_vm0, %v985_v32  ;;  %v987_v32 = vpack.c.bf16 %v940_v23, %v939_v22 }
 0x30a   : > { %2613 = vmatmul.msk.bf16.gmra.mxu2 %vm274_vm0, %v999_v35  ;;  %2641 = vmatmul.msk.bf16.gmra.mxu3 %vm274_vm0, %v999_v35  ;;  %v1001_v35 = vpack.c.bf16 %v968_v25, %v967_v24  ;;  %v1002_v25 = vpack.c.bf16 %v970_v21, %v969_v20 }
 0x319   : > { %2600 = vmatmul.msk.bf16.gmra.mxu0 %vm274_vm0, %v986_v62  ;;  %2628 = vmatmul.msk.bf16.gmra.mxu1 %vm274_vm0, %v986_v62  ;;  %v885_v62 = vunpack.c.l.bf16 %v3395_v46 }
 0x31a   : > { %2614 = vmatmul.msk.bf16.gmra.mxu2 %vm274_vm0, %v1000_v63  ;;  %2642 = vmatmul.msk.bf16.gmra.mxu3 %vm274_vm0, %v1000_v63  ;;  %v886_v63 = vunpack.c.l.bf16 %v3399_v47 }
 0x31b   : > { %v941_v18 = vsub.f32 %v773_v36, %v885_v62 }
 0x31c   : > { %v942_v19 = vsub.f32 %v774_v38, %v886_v63 }
 0x31e   : > { %v988_v24 = vpack.c.bf16 %v942_v19, %v941_v18  ;;  %v916_v18 = vunpack.c.l.bf16 %v3435_v39  ;;  %v806_v39 = vld [vmem:[#allocation2 + $0x198] sm:$0xff] }
 0x326   : > { %v3391_v37 = vpop.f32.mrf.mxu0  ;;  %v3393_v45 = vpop.f32.mrf.mxu1 }
 0x329   : > { %2601 = vmatmul.msk.bf16.gmra.mxu0 %vm274_vm0, %v987_v32  ;;  %2629 = vmatmul.msk.bf16.gmra.mxu1 %vm274_vm0, %v987_v32  ;;  %v775_v32 = vld [vmem:[#allocation2 + $0xa0] sm:$0xff] }
 0x32a   : > { %2615 = vmatmul.msk.bf16.gmra.mxu2 %vm274_vm0, %v1001_v35  ;;  %2643 = vmatmul.msk.bf16.gmra.mxu3 %vm274_vm0, %v1001_v35  ;;  %v3427_v13 = vpack.c.bf16 %v775_v32, %v775_v32 }
 0x32c   : > { %v887_v63 = vunpack.c.l.bf16 %v3427_v13 }
 0x32d   : > { %v3407_v58 = vpop.f32.mrf.mxu2  ;;  %v3409_v59 = vpop.f32.mrf.mxu3 }
 0x32e   : > { %4243 = vst [vmem:[#allocation32_spill] sm:$0xff] %v3407_v58  ;;  %v3415_v0 = vpop.f32.mrf.mxu0  ;;  %v3417_v1 = vpop.f32.mrf.mxu1  ;;  %v803_v58 = vld [vmem:[#allocation2 + $0x180] sm:$0xff]  ;;  %v943_v21 = vsub.f32 %v775_v32, %v887_v63  ;;  %v889_v63 = vunpack.c.l.bf16 %v3459_v55 }
 0x32f   : > { %4244 = vst [vmem:[#allocation33_spill] sm:$0xff] %v3409_v59  ;;  %v776_v59 = vld [vmem:[#allocation2 + $0xa8] sm:$0xff]  ;;  %v3433_v38 = vpack.c.bf16 %v803_v58, %v803_v58 }
 0x330   : > { %v3431_v36 = vpack.c.bf16 %v776_v59, %v776_v59 }
 0x331   : > { %4247 = vst [vmem:[#allocation36_spill] sm:$0xff] %v3433_v38  ;;  %v915_v5 = vunpack.c.l.bf16 %v3433_v38  ;;  %v778_v38 = vld [vmem:[#allocation2 + $0xb8] sm:$0xff] }
 0x332   : > { %v888_v4 = vunpack.c.l.bf16 %v3431_v36 }
 0x335   : > { %v3419_v22 = vpop.f32.mrf.mxu2  ;;  %v3421_v23 = vpop.f32.mrf.mxu3 }
 0x336   : > { %4245 = vst [vmem:[#allocation34_spill] sm:$0xff] %v3419_v22  ;;  %v3423_v35 = vpop.f32.mrf.mxu0  ;;  %v3425_v56 = vpop.f32.mrf.mxu1 }
 0x337   : > { %4246 = vst [vmem:[#allocation35_spill] sm:$0xff] %v3421_v23  ;;  %v971_v23 = vsub.f32 %v803_v58, %v915_v5  ;;  %v3465_v58 = vpack.c.bf16 %v805_v17, %v805_v17 }
 0x339   : > { %2602 = vmatmul.msk.bf16.gmra.mxu0 %vm274_vm0, %v988_v24  ;;  %2630 = vmatmul.msk.bf16.gmra.mxu1 %vm274_vm0, %v988_v24  ;;  %v944_v24 = vsub.f32 %v776_v59, %v888_v4  ;;  %4253 = vst [vmem:[#allocation42_spill] sm:$0xff] %v3465_v58  ;;  %v3467_v59 = vpack.c.bf16 %v806_v39, %v806_v39  ;;  %v917_v5 = vunpack.c.l.bf16 %v3465_v58  ;;  %v780_v58 = vld [vmem:[#allocation2 + $0xc8] sm:$0xff] }
 0x33a   : > { %2616 = vmatmul.msk.bf16.gmra.mxu2 %vm274_vm0, %v1002_v25  ;;  %2644 = vmatmul.msk.bf16.gmra.mxu3 %vm274_vm0, %v1002_v25  ;;  %v972_v25 = vsub.f32 %v804_v57, %v916_v18  ;;  %v3463_v57 = vpack.c.bf16 %v778_v38, %v778_v38 }
 0x33b   : > { %4254 = vst [vmem:[#allocation43_spill] sm:$0xff] %v3467_v59  ;;  %v918_v18 = vunpack.c.l.bf16 %v3467_v59  ;;  %v808_v59 = vld [vmem:[#allocation2 + $0x1a8] sm:$0xff] }
 0x33c   : > { %v1003_v12 = vpack.c.bf16 %v972_v25, %v971_v23  ;;  %v890_v4 = vunpack.c.l.bf16 %v3463_v57  ;;  %v945_v25 = vsub.f32 %v777_v43, %v889_v63  ;;  %v3497_v43 = vpack.c.bf16 %v807_v11, %v807_v11 }
 0x33d   : > { %v3439_v44 = vpop.f32.mrf.mxu2  ;;  %v3441_v62 = vpop.f32.mrf.mxu3  ;;  %v891_v63 = vunpack.c.l.bf16 %v3491_v53 }
 0x33e   : > { %4249 = vst [vmem:[#allocation38_spill] sm:$0xff] %v3439_v44  ;;  %v3447_v19 = vpop.f32.mrf.mxu0  ;;  %v3449_v20 = vpop.f32.mrf.mxu1 }
 0x33f   : > { %4250 = vst [vmem:[#allocation39_spill] sm:$0xff] %v3441_v62  ;;  %v989_v62 = vpack.c.bf16 %v944_v24, %v943_v21 }
 0x340   : > { %4259 = vst [vmem:[#allocation48_spill] sm:$0xff] %v3497_v43 }
 0x345   : > { %v3451_v22 = vpop.f32.mrf.mxu2  ;;  %v3453_v44 = vpop.f32.mrf.mxu3 }
 0x346   : > { %4251 = vst [vmem:[#allocation40_spill] sm:$0xff] %v3451_v22  ;;  %v3455_v42 = vpop.f32.mrf.mxu0  ;;  %v3457_v16 = vpop.f32.mrf.mxu1 }
 0x347   : > { %4252 = vst [vmem:[#allocation41_spill] sm:$0xff] %v3453_v44  ;;  %v973_v44 = vsub.f32 %v805_v17, %v917_v5  ;;  %v3495_v17 = vpack.c.bf16 %v780_v58, %v780_v58  ;;  %v919_v5 = vunpack.c.l.bf16 %v3497_v43 }
 0x349   : > { %2603 = vmatmul.msk.bf16.gmra.mxu0 %vm274_vm0, %v989_v62  ;;  %2631 = vmatmul.msk.bf16.gmra.mxu1 %vm274_vm0, %v989_v62  ;;  %v946_v62 = vsub.f32 %v778_v38, %v890_v4  ;;  %v3499_v38 = vpack.c.bf16 %v808_v59, %v808_v59  ;;  %v892_v4 = vunpack.c.l.bf16 %v3495_v17 }
 0x34a   : > { %2617 = vmatmul.msk.bf16.gmra.mxu2 %vm274_vm0, %v1003_v12  ;;  %2645 = vmatmul.msk.bf16.gmra.mxu3 %vm274_vm0, %v1003_v12  ;;  %v974_v12 = vsub.f32 %v806_v39, %v918_v18 }
 0x34b   : > { %4260 = vst [vmem:[#allocation49_spill] sm:$0xff] %v3499_v38  ;;  %v920_v18 = vunpack.c.l.bf16 %v3499_v38 }
 0x34c   : > { %v1004_v54 = vpack.c.bf16 %v974_v12, %v973_v44  ;;  %v947_v12 = vsub.f32 %v779_v29, %v891_v63 }
 0x34d   : > { %v3471_v23 = vpop.f32.mrf.mxu2  ;;  %v3473_v32 = vpop.f32.mrf.mxu3 }
 0x34e   : > { %4255 = vst [vmem:[#allocation44_spill] sm:$0xff] %v3471_v23  ;;  %v3479_v21 = vpop.f32.mrf.mxu0  ;;  %v3481_v24 = vpop.f32.mrf.mxu1 }
 0x34f   : > { %4256 = vst [vmem:[#allocation45_spill] sm:$0xff] %v3473_v32  ;;  %v990_v32 = vpack.c.bf16 %v946_v62, %v945_v25 }
 0x355   : > { %v3483_v22 = vpop.f32.mrf.mxu2  ;;  %v3485_v23 = vpop.f32.mrf.mxu3 }
 0x356   : > { %4257 = vst [vmem:[#allocation46_spill] sm:$0xff] %v3483_v22  ;;  %v3487_v28 = vpop.f32.mrf.mxu0  ;;  %v3489_v10 = vpop.f32.mrf.mxu1 }
 0x357   : > { %4258 = vst [vmem:[#allocation47_spill] sm:$0xff] %v3485_v23  ;;  %v975_v23 = vsub.f32 %v807_v11, %v919_v5 }
 0x359   : > { %2604 = vmatmul.msk.bf16.gmra.mxu0 %vm274_vm0, %v990_v32  ;;  %2632 = vmatmul.msk.bf16.gmra.mxu1 %vm274_vm0, %v990_v32  ;;  %v948_v32 = vsub.f32 %v780_v58, %v892_v4  ;;  %v3525_v58 = vpack.c.bf16 %v781_v33, %v781_v33 }
 0x35a   : > { %2618 = vmatmul.msk.bf16.gmra.mxu2 %vm274_vm0, %v1004_v54  ;;  %2646 = vmatmul.msk.bf16.gmra.mxu3 %vm274_vm0, %v1004_v54  ;;  %v976_v54 = vsub.f32 %v808_v59, %v920_v18 }
 0x35b   : > { %v991_v34 = vpack.c.bf16 %v948_v32, %v947_v12  ;;  %4267 = vst [vmem:[#allocation56_spill] sm:$0xff] %v3525_v58 }
 0x35c   : > { %v1005_v43 = vpack.c.bf16 %v976_v54, %v975_v23 }
 0x35d   : > { %v3503_v39 = vpop.f32.mrf.mxu2  ;;  %v3505_v44 = vpop.f32.mrf.mxu3 }
 0x35e   : > { %4261 = vst [vmem:[#allocation50_spill] sm:$0xff] %v3503_v39  ;;  %v3511_v25 = vpop.f32.mrf.mxu0  ;;  %v3513_v62 = vpop.f32.mrf.mxu1  ;;  %v1472_v39 = vunpack.c.l.b16 %v3251_v60 }
 0x35f   : > { %4262 = vst [vmem:[#allocation51_spill] sm:$0xff] %v3505_v44  ;;  %v1473_v44 = vunpack.c.l.b16 %v3253_v61  ;;  %v3531_v61 = vpack.c.bf16 %v809_v7, %v809_v7 }
 0x360   : > { %4263 = vst [vmem:[#allocation52_spill] sm:$0xff] %v3511_v25  ;;  %v782_v25 = vld [vmem:[#allocation2 + $0xd8] sm:$0xff] }
 0x361   : > { %4264 = vst [vmem:[#allocation53_spill] sm:$0xff] %v3513_v62  ;;  %v810_v62 = vld [vmem:[#allocation2 + $0x1b8] sm:$0xff]  ;;  %v1528_v11 = vpack.c.b16 %v1473_v44, %v1472_v39  ;;  %v3529_v60 = vpack.c.bf16 %v782_v25, %v782_v25  ;;  %v893_v39 = vunpack.c.l.bf16 %v3525_v58  ;;  %v921_v4 = vunpack.c.l.bf16 %v3531_v61 }
 0x362   : > { %4269 = vst [vmem:[#allocation58_spill] sm:$0xff] %v3531_v61  ;;  %v3533_v59 = vpack.c.bf16 %v810_v62, %v810_v62 }
 0x363   : > { %4268 = vst [vmem:[#allocation57_spill] sm:$0xff] %v3529_v60  ;;  %v894_v44 = vunpack.c.l.bf16 %v3529_v60  ;;  %v949_v32 = vsub.f32 %v781_v33, %v893_v39  ;;  %v977_v54 = vsub.f32 %v809_v7, %v921_v4 }
 0x364   : > { %4270 = vst [vmem:[#allocation59_spill] sm:$0xff] %v3533_v59  ;;  %v922_v5 = vunpack.c.l.bf16 %v3533_v59 }
 0x365   : > { %v3517_v22 = vpop.f32.mrf.mxu2  ;;  %v3519_v52 = vpop.f32.mrf.mxu3 }
 0x366   : > { %4265 = vst [vmem:[#allocation54_spill] sm:$0xff] %v3517_v22  ;;  %v3521_v38 = vpop.f32.mrf.mxu0  ;;  %v3523_v29 = vpop.f32.mrf.mxu1 }
 0x367   : > { %4266 = vst [vmem:[#allocation55_spill] sm:$0xff] %v3519_v52 }
 0x369   : > { %2605 = vmatmul.msk.bf16.gmra.mxu0 %vm274_vm0, %v991_v34  ;;  %2633 = vmatmul.msk.bf16.gmra.mxu1 %vm274_vm0, %v991_v34  ;;  %v950_v34 = vsub.f32 %v782_v25, %v894_v44  ;;  %v1476_v25 = vunpack.c.l.b16 %v3279_v50 }
 0x36a   : > { %2619 = vmatmul.msk.bf16.gmra.mxu2 %vm274_vm0, %v1005_v43  ;;  %2647 = vmatmul.msk.bf16.gmra.mxu3 %vm274_vm0, %v1005_v43  ;;  %v978_v43 = vsub.f32 %v810_v62, %v922_v5  ;;  %v1477_v62 = vunpack.c.l.b16 %v3283_v51  ;;  %v1478_v5 = vunpack.c.l.b16 %v3295_v8 }
 0x36b   : > { %v992_v60 = vpack.c.bf16 %v950_v34, %v949_v32  ;;  %v1479_v32 = vunpack.c.l.b16 %v3299_v9 }
 0x36c   : > { %v1006_v61 = vpack.c.bf16 %v978_v43, %v977_v54 }
 0x36d   : > { %v3537_v23 = vpop.f32.mrf.mxu2  ;;  %v3539_v63 = vpop.f32.mrf.mxu3 }
 0x36e   : > { %4271 = vst [vmem:[#allocation60_spill] sm:$0xff] %v3537_v23  ;;  %v3545_v18 = vpop.f32.mrf.mxu0  ;;  %v3547_v12 = vpop.f32.mrf.mxu1  ;;  %v1474_v23 = vunpack.c.l.b16 %v3265_v30 }
 0x36f   : > { %4272 = vst [vmem:[#allocation61_spill] sm:$0xff] %v3539_v63  ;;  %v1475_v63 = vunpack.c.l.b16 %v3267_v31 }
 0x370   : > { %4273 = vst [vmem:[#allocation62_spill] sm:$0xff] %v3545_v18 }
 0x371   : > { %v1529_v18 = vpack.c.b16 %v1475_v63, %v1474_v23 }
 0x375   : > { %v3551_v52 = vpop.f32.mrf.mxu2  ;;  %v3553_v22 = vpop.f32.mrf.mxu3 }
 0x376   : > { %4274 = vst [vmem:[#allocation63_spill] sm:$0xff] %v3551_v52  ;;  %v3555_v58 = vpop.f32.mrf.mxu0  ;;  %v3557_v59 = vpop.f32.mrf.mxu1 }
 0x377   : > { %4275 = vst [vmem:[#allocation64_spill] sm:$0xff] %v3553_v22 }
 0x379   : > { %2606 = vmatmul.msk.bf16.gmra.mxu0 %vm274_vm0, %v992_v60  ;;  %2634 = vmatmul.msk.bf16.gmra.mxu1 %vm274_vm0, %v992_v60 }
 0x37a   : > { %2620 = vmatmul.msk.bf16.gmra.mxu2 %vm274_vm0, %v1006_v61  ;;  %2648 = vmatmul.msk.bf16.gmra.mxu3 %vm274_vm0, %v1006_v61  ;;  %v1530_v61 = vpack.c.b16 %v1477_v62, %v1476_v25 }
 0x37d   : > { %v3563_v7 = vpop.f32.mrf.mxu2  ;;  %v3565_v30 = vpop.f32.mrf.mxu3 }
 0x37e   : > { %4276 = vst [vmem:[#allocation65_spill] sm:$0xff] %v3563_v7  ;;  %v3567_v31 = vpop.f32.mrf.mxu0  ;;  %v3569_v33 = vpop.f32.mrf.mxu1 }
 0x37f   : > { %4277 = vst [vmem:[#allocation66_spill] sm:$0xff] %v3565_v30 }
 0x385   : > { %v3573_v23 = vpop.f32.mrf.mxu2  ;;  %v3575_v63 = vpop.f32.mrf.mxu3 }
 0x386   : > { %4278 = vst [vmem:[#allocation67_spill] sm:$0xff] %v3573_v23  ;;  %v3577_v39 = vpop.f32.mrf.mxu0  ;;  %v3579_v60 = vpop.f32.mrf.mxu1 }
 0x387   : > { %4279 = vst [vmem:[#allocation68_spill] sm:$0xff] %v3575_v63 }
 0x389   : > { %2705 = vmatmul.msk.bf16.vlgmr.msrb.gmra.mxu0 %vm274_vm0, %v1528_v11  ;;  %2733 = vmatmul.msk.bf16.vlgmr.msrb.gmra.mxu1 %vm274_vm0, %v1528_v11 }
 0x38a   : > { %2649 = vmatmul.msk.bf16.vlgmr.msrb.gmra.mxu2 %vm274_vm0, %v1528_v11  ;;  %2677 = vmatmul.msk.bf16.vlgmr.msrb.gmra.mxu3 %vm274_vm0, %v1528_v11  ;;  %v1531_v11 = vpack.c.b16 %v1479_v32, %v1478_v5  ;;  %v1481_v5 = vunpack.c.l.b16 %v3315_v27 }
 0x38d   : > { %v3585_v50 = vpop.f32.mrf.mxu2  ;;  %v3587_v51 = vpop.f32.mrf.mxu3 }
 0x38e   : > { %4280 = vst [vmem:[#allocation69_spill] sm:$0xff] %v3585_v50  ;;  %v3589_v44 = vpop.f32.mrf.mxu0  ;;  %v3591_v4 = vpop.f32.mrf.mxu1 }
 0x38f   : > { %4281 = vst [vmem:[#allocation70_spill] sm:$0xff] %v3587_v51 }
 0x395   : > { %v3595_v34 = vpop.f32.mrf.mxu2  ;;  %v3597_v54 = vpop.f32.mrf.mxu3 }
 0x396   : > { %4282 = vst [vmem:[#allocation71_spill] sm:$0xff] %v3595_v34  ;;  %v3599_v43 = vpop.f32.mrf.mxu0  ;;  %v3601_v25 = vpop.f32.mrf.mxu1  ;;  %v1480_v34 = vunpack.c.l.b16 %v3311_v26 }
 0x397   : > { %4283 = vst [vmem:[#allocation72_spill] sm:$0xff] %v3597_v54 }
 0x399   : > { %2706 = vmatmul.msk.bf16.gmra.mxu0 %vm274_vm0, %v1529_v18  ;;  %2734 = vmatmul.msk.bf16.gmra.mxu1 %vm274_vm0, %v1529_v18 }
 0x39a   : > { %2650 = vmatmul.msk.bf16.gmra.mxu2 %vm274_vm0, %v1529_v18  ;;  %2678 = vmatmul.msk.bf16.gmra.mxu3 %vm274_vm0, %v1529_v18  ;;  %v1532_v18 = vpack.c.b16 %v1481_v5, %v1480_v34  ;;  %v1483_v34 = vunpack.c.l.b16 %v3331_v49 }
 0x39d   : > { %v3607_v8 = vpop.f32.mrf.mxu2  ;;  %v3609_v9 = vpop.f32.mrf.mxu3 }
 0x39e   : > { %4284 = vst [vmem:[#allocation73_spill] sm:$0xff] %v3607_v8  ;;  %v3611_v62 = vpop.f32.mrf.mxu0  ;;  %v3613_v54 = vpop.f32.mrf.mxu1 }
 0x39f   : > { %4285 = vst [vmem:[#allocation74_spill] sm:$0xff] %v3609_v9  ;;  %v1482_v9 = vunpack.c.l.b16 %v3327_v48 }
 0x3a5   : > { %v3617_v32 = vpop.f32.mrf.mxu2  ;;  %v3619_v51 = vpop.f32.mrf.mxu3 }
 0x3a6   : > { %4286 = vst [vmem:[#allocation75_spill] sm:$0xff] %v3617_v32  ;;  %v3621_v50 = vpop.f32.mrf.mxu0  ;;  %v3623_v63 = vpop.f32.mrf.mxu1 }
 0x3a7   : > { %4287 = vst [vmem:[#allocation76_spill] sm:$0xff] %v3619_v51 }
 0x3a9   : > { %2707 = vmatmul.msk.bf16.gmra.mxu0 %vm274_vm0, %v1530_v61  ;;  %2735 = vmatmul.msk.bf16.gmra.mxu1 %vm274_vm0, %v1530_v61 }
 0x3aa   : > { %2651 = vmatmul.msk.bf16.gmra.mxu2 %vm274_vm0, %v1530_v61  ;;  %2679 = vmatmul.msk.bf16.gmra.mxu3 %vm274_vm0, %v1530_v61  ;;  %v1533_v61 = vpack.c.b16 %v1483_v34, %v1482_v9  ;;  %v1485_v9 = vunpack.c.l.b16 %v3347_v15 }
 0x3ad   : > { %v3629_v26 = vpop.f32.mrf.mxu2  ;;  %v3631_v27 = vpop.f32.mrf.mxu3 }
 0x3ae   : > { %4288 = vst [vmem:[#allocation77_spill] sm:$0xff] %v3629_v26  ;;  %v3633_v32 = vpop.f32.mrf.mxu0  ;;  %v3635_v51 = vpop.f32.mrf.mxu1 }
 0x3af   : > { %4289 = vst [vmem:[#allocation78_spill] sm:$0xff] %v3631_v27  ;;  %v1484_v27 = vunpack.c.l.b16 %v3343_v14 }
 0x3b5   : > { %v3639_v5 = vpop.f32.mrf.mxu2  ;;  %v3641_v8 = vpop.f32.mrf.mxu3 }
 0x3b6   : > { %4290 = vst [vmem:[#allocation79_spill] sm:$0xff] %v3639_v5  ;;  %v3643_v23 = vpop.f32.mrf.mxu0  ;;  %v3645_v30 = vpop.f32.mrf.mxu1 }
 0x3b7   : > { %4291 = vst [vmem:[#allocation80_spill] sm:$0xff] %v3641_v8 }
 0x3b9   : > { %2708 = vmatmul.msk.bf16.gmra.mxu0 %vm274_vm0, %v1531_v11  ;;  %2736 = vmatmul.msk.bf16.gmra.mxu1 %vm274_vm0, %v1531_v11 }
 0x3ba   : > { %2652 = vmatmul.msk.bf16.gmra.mxu2 %vm274_vm0, %v1531_v11  ;;  %2680 = vmatmul.msk.bf16.gmra.mxu3 %vm274_vm0, %v1531_v11  ;;  %v1534_v11 = vpack.c.b16 %v1485_v9, %v1484_v27  ;;  %v1487_v27 = vunpack.c.l.b16 %v3363_v41 }
 0x3bd   : > { %v3651_v48 = vpop.f32.mrf.mxu2  ;;  %v3653_v49 = vpop.f32.mrf.mxu3 }
 0x3be   : > { %4292 = vst [vmem:[#allocation81_spill] sm:$0xff] %v3651_v48  ;;  %v3655_v5 = vpop.f32.mrf.mxu0  ;;  %v3657_v8 = vpop.f32.mrf.mxu1 }
 0x3bf   : > { %4293 = vst [vmem:[#allocation82_spill] sm:$0xff] %v3653_v49  ;;  %v1486_v49 = vunpack.c.l.b16 %v3359_v40 }
 0x3c5   : > { %v3661_v34 = vpop.f32.mrf.mxu2  ;;  %v3663_v26 = vpop.f32.mrf.mxu3 }
 0x3c6   : > { %4294 = vst [vmem:[#allocation83_spill] sm:$0xff] %v3661_v34  ;;  %v3665_v7 = vpop.f32.mrf.mxu0  ;;  %v3667_v22 = vpop.f32.mrf.mxu1 }
 0x3c7   : > { %4295 = vst [vmem:[#allocation84_spill] sm:$0xff] %v3663_v26 }
 0x3c8   : > { %4296 = vst [vmem:[#allocation85_spill] sm:$0xff] %v3667_v22 }
 0x3c9   : > { %2709 = vmatmul.msk.bf16.gmra.mxu0 %vm274_vm0, %v1532_v18  ;;  %2737 = vmatmul.msk.bf16.gmra.mxu1 %vm274_vm0, %v1532_v18 }
 0x3ca   : > { %2653 = vmatmul.msk.bf16.gmra.mxu2 %vm274_vm0, %v1532_v18  ;;  %2681 = vmatmul.msk.bf16.gmra.mxu3 %vm274_vm0, %v1532_v18  ;;  %v1535_v18 = vpack.c.b16 %v1487_v27, %v1486_v49  ;;  %v1489_v49 = vunpack.c.l.b16 %v3379_v3 }
 0x3cd   : > { %v3673_v14 = vpop.f32.mrf.mxu2  ;;  %v3675_v15 = vpop.f32.mrf.mxu3 }
 0x3ce   : > { %4297 = vst [vmem:[#allocation86_spill] sm:$0xff] %v3673_v14  ;;  %v3677_v34 = vpop.f32.mrf.mxu0  ;;  %v3679_v26 = vpop.f32.mrf.mxu1 }
 0x3cf   : > { %4298 = vst [vmem:[#allocation87_spill] sm:$0xff] %v3675_v15  ;;  %v1488_v15 = vunpack.c.l.b16 %v3375_v2 }
 0x3d5   : > { %v3683_v9 = vpop.f32.mrf.mxu2  ;;  %v3685_v48 = vpop.f32.mrf.mxu3 }
 0x3d6   : > { %4299 = vst [vmem:[#allocation88_spill] sm:$0xff] %v3683_v9  ;;  %v3687_v52 = vpop.f32.mrf.mxu0  ;;  %v3689_v22 = vpop.f32.mrf.mxu1 }
 0x3d7   : > { %4300 = vst [vmem:[#allocation89_spill] sm:$0xff] %v3685_v48 }
 0x3d8   : > { %4301 = vst [vmem:[#allocation90_spill] sm:$0xff] %v3687_v52 }
 0x3d9   : > { %4302 = vst [vmem:[#allocation91_spill] sm:$0xff] %v3689_v22  ;;  %2710 = vmatmul.msk.bf16.gmra.mxu0 %vm274_vm0, %v1533_v61  ;;  %2738 = vmatmul.msk.bf16.gmra.mxu1 %vm274_vm0, %v1533_v61 }
 0x3da   : > { %2654 = vmatmul.msk.bf16.gmra.mxu2 %vm274_vm0, %v1533_v61  ;;  %2682 = vmatmul.msk.bf16.gmra.mxu3 %vm274_vm0, %v1533_v61  ;;  %v1536_v61 = vpack.c.b16 %v1489_v49, %v1488_v15  ;;  %v1491_v15 = vunpack.c.l.b16 %v3399_v47 }
 0x3dd   : > { %v3695_v40 = vpop.f32.mrf.mxu2  ;;  %v3697_v41 = vpop.f32.mrf.mxu3 }
 0x3de   : > { %4303 = vst [vmem:[#allocation92_spill] sm:$0xff] %v3695_v40  ;;  %v3699_v9 = vpop.f32.mrf.mxu0  ;;  %v3701_v48 = vpop.f32.mrf.mxu1 }
 0x3df   : > { %4304 = vst [vmem:[#allocation93_spill] sm:$0xff] %v3697_v41  ;;  %v1490_v41 = vunpack.c.l.b16 %v3395_v46 }
 0x3e5   : > { %v3705_v27 = vpop.f32.mrf.mxu2  ;;  %v3707_v14 = vpop.f32.mrf.mxu3 }
 0x3e6   : > { %4305 = vst [vmem:[#allocation94_spill] sm:$0xff] %v3705_v27  ;;  %v3709_v22 = vpop.f32.mrf.mxu0  ;;  %v3711_v52 = vpop.f32.mrf.mxu1 }
 0x3e7   : > { %4306 = vst [vmem:[#allocation95_spill] sm:$0xff] %v3707_v14 }
 0x3e8   : > { %4307 = vst [vmem:[#allocation96_spill] sm:$0xff] %v3709_v22 }
 0x3e9   : > { %4308 = vst [vmem:[#allocation97_spill] sm:$0xff] %v3711_v52  ;;  %2711 = vmatmul.msk.bf16.gmra.mxu0 %vm274_vm0, %v1534_v11  ;;  %2739 = vmatmul.msk.bf16.gmra.mxu1 %vm274_vm0, %v1534_v11 }
 0x3ea   : > { %2655 = vmatmul.msk.bf16.gmra.mxu2 %vm274_vm0, %v1534_v11  ;;  %2683 = vmatmul.msk.bf16.gmra.mxu3 %vm274_vm0, %v1534_v11  ;;  %v1537_v11 = vpack.c.b16 %v1491_v15, %v1490_v41  ;;  %v1493_v41 = vunpack.c.l.b16 %v3431_v36 }
 0x3ed   : > { %v3717_v2 = vpop.f32.mrf.mxu2  ;;  %v3719_v3 = vpop.f32.mrf.mxu3 }
 0x3ee   : > { %4309 = vst [vmem:[#allocation98_spill] sm:$0xff] %v3717_v2  ;;  %v3721_v27 = vpop.f32.mrf.mxu0  ;;  %v3723_v14 = vpop.f32.mrf.mxu1 }
 0x3ef   : > { %4310 = vst [vmem:[#allocation99_spill] sm:$0xff] %v3719_v3  ;;  %v1492_v3 = vunpack.c.l.b16 %v3427_v13 }
 0x3f0   : > { %4311 = vst [vmem:[#allocation100_spill] sm:$0xff] %v3723_v14 }
 0x3f5   : > { %v3727_v49 = vpop.f32.mrf.mxu2  ;;  %v3729_v40 = vpop.f32.mrf.mxu3 }
 0x3f6   : > { %4312 = vst [vmem:[#allocation101_spill] sm:$0xff] %v3727_v49  ;;  %v3731_v52 = vpop.f32.mrf.mxu0  ;;  %v3733_v22 = vpop.f32.mrf.mxu1 }
 0x3f7   : > { %4313 = vst [vmem:[#allocation102_spill] sm:$0xff] %v3729_v40 }
 0x3f8   : > { %4314 = vst [vmem:[#allocation103_spill] sm:$0xff] %v3731_v52 }
 0x3f9   : > { %4315 = vst [vmem:[#allocation104_spill] sm:$0xff] %v3733_v22  ;;  %2712 = vmatmul.msk.bf16.gmra.mxu0 %vm274_vm0, %v1535_v18  ;;  %2740 = vmatmul.msk.bf16.gmra.mxu1 %vm274_vm0, %v1535_v18 }
 0x3fa   : > { %2656 = vmatmul.msk.bf16.gmra.mxu2 %vm274_vm0, %v1535_v18  ;;  %2684 = vmatmul.msk.bf16.gmra.mxu3 %vm274_vm0, %v1535_v18  ;;  %v1538_v18 = vpack.c.b16 %v1493_v41, %v1492_v3  ;;  %v1494_v41 = vunpack.c.l.b16 %v3459_v55 }
 0x3fd   : > { %v3739_v46 = vpop.f32.mrf.mxu2  ;;  %v3741_v47 = vpop.f32.mrf.mxu3 }
 0x3fe   : > { %4316 = vst [vmem:[#allocation105_spill] sm:$0xff] %v3739_v46  ;;  %v3743_v49 = vpop.f32.mrf.mxu0  ;;  %v3745_v40 = vpop.f32.mrf.mxu1 }
 0x3ff   : > { %4317 = vst [vmem:[#allocation106_spill] sm:$0xff] %v3741_v47 }
 0x400   : > { %4318 = vst [vmem:[#allocation107_spill] sm:$0xff] %v3743_v49 }
 0x401   : > { %4319 = vst [vmem:[#allocation108_spill] sm:$0xff] %v3745_v40 }
 0x405   : > { %v3749_v15 = vpop.f32.mrf.mxu2  ;;  %v3751_v2 = vpop.f32.mrf.mxu3 }
 0x406   : > { %4320 = vst [vmem:[#allocation109_spill] sm:$0xff] %v3749_v15  ;;  %v1947_v22 = vpop.f32.mrf.mxu0  ;;  %v2096_v52 = vpop.f32.mrf.mxu1 }
 0x407   : > { %4321 = vst [vmem:[#allocation110_spill] sm:$0xff] %v3751_v2 }
 0x409   : > { %2713 = vmatmul.msk.bf16.gmra.mxu0 %vm274_vm0, %v1536_v61  ;;  %2741 = vmatmul.msk.bf16.gmra.mxu1 %vm274_vm0, %v1536_v61 }
 0x40a   : > { %2657 = vmatmul.msk.bf16.gmra.mxu2 %vm274_vm0, %v1536_v61  ;;  %2685 = vmatmul.msk.bf16.gmra.mxu3 %vm274_vm0, %v1536_v61  ;;  %v1495_v61 = vunpack.c.l.b16 %v3463_v57 }
 0x40d   : > { %v1649_v13 = vpop.f32.mrf.mxu2  ;;  %v1798_v47 = vpop.f32.mrf.mxu3 }
 0x40e   : > { %v1650_v36 = vadd.f32 %v1649_v13, %v3391_v37  ;;  %v1799_v15 = vadd.f32 %v1798_v47, %v3393_v45  ;;  %v1949_v2 = vpop.f32.mrf.mxu0  ;;  %v2098_v40 = vpop.f32.mrf.mxu1 }
 0x410   : > { %v2236_v46 = vadd.f32 %v1947_v22, %v1650_v36  ;;  %v2237_v3 = vadd.f32 %v2096_v52, %v1799_v15  ;;  %v1539_v52 = vpack.c.b16 %v1495_v61, %v1494_v41 }
 0x412   : > { %2348 = vst [vmem:[%s3170_s26] sm:$0xff] %v2236_v46 }
 0x413   : > { %2350 = vst.msk [vmem:[%s3170_s26 + $0x8] sm:$0xff] %vm2349_vm1, %v2237_v3 }
 0x415   : > { %v1651_v49 = vpop.f32.mrf.mxu2  ;;  %v1800_v13 = vpop.f32.mrf.mxu3 }
 0x416   : > { %v1652_v37 = vadd.f32 %v1651_v49, %v3415_v0  ;;  %v1801_v45 = vadd.f32 %v1800_v13, %v3417_v1  ;;  %v1952_v47 = vpop.f32.mrf.mxu0  ;;  %v2101_v36 = vpop.f32.mrf.mxu1 }
 0x418   : > { %v2238_v22 = vadd.f32 %v1949_v2, %v1652_v37  ;;  %v2239_v14 = vadd.f32 %v2098_v40, %v1801_v45 }
 0x419   : > { %2714 = vmatmul.msk.bf16.gmra.mxu0 %vm274_vm0, %v1537_v11  ;;  %2742 = vmatmul.msk.bf16.gmra.mxu1 %vm274_vm0, %v1537_v11 }
 0x41a   : > { %2351 = vst [vmem:[%s3170_s26 + $0x10] sm:$0xff] %v2238_v22  ;;  %2658 = vmatmul.msk.bf16.gmra.mxu2 %vm274_vm0, %v1537_v11  ;;  %2686 = vmatmul.msk.bf16.gmra.mxu3 %vm274_vm0, %v1537_v11 }
 0x41b   : > { %2352 = vst.msk [vmem:[%s3170_s26 + $0x18] sm:$0xff] %vm2349_vm1, %v2239_v14 }
 0x41d   : > { %v1654_v55 = vpop.f32.mrf.mxu2  ;;  %v1803_v1 = vpop.f32.mrf.mxu3 }
 0x41e   : > { %v1655_v0 = vadd.f32 %v1654_v55, %v3423_v35  ;;  %v1804_v57 = vadd.f32 %v1803_v1, %v3425_v56  ;;  %v1954_v40 = vpop.f32.mrf.mxu0  ;;  %v2103_v49 = vpop.f32.mrf.mxu1 }
 0x420   : > { %v2240_v2 = vadd.f32 %v1952_v47, %v1655_v0  ;;  %v2241_v46 = vadd.f32 %v2101_v36, %v1804_v57 }
 0x422   : > { %2353 = vst [vmem:[%s3170_s26 + $0x20] sm:$0xff] %v2240_v2 }
 0x423   : > { %2354 = vst.msk [vmem:[%s3170_s26 + $0x28] sm:$0xff] %vm2349_vm1, %v2241_v46 }
 0x425   : > { %v1656_v14 = vpop.f32.mrf.mxu2  ;;  %v1805_v3 = vpop.f32.mrf.mxu3 }
 0x426   : > { %v1657_v15 = vadd.f32 %v1656_v14, %v3447_v19  ;;  %v1806_v11 = vadd.f32 %v1805_v3, %v3449_v20  ;;  %v1957_v41 = vpop.f32.mrf.mxu0  ;;  %v2106_v61 = vpop.f32.mrf.mxu1 }
 0x428   : > { %v2242_v35 = vadd.f32 %v1954_v40, %v1657_v15  ;;  %v2243_v37 = vadd.f32 %v2103_v49, %v1806_v11  ;;  %v1496_v11 = vunpack.c.l.b16 %v3491_v53 }
 0x429   : > { %2715 = vmatmul.msk.bf16.gmra.mxu0 %vm274_vm0, %v1538_v18  ;;  %2743 = vmatmul.msk.bf16.gmra.mxu1 %vm274_vm0, %v1538_v18 }
 0x42a   : > { %2355 = vst [vmem:[%s3170_s26 + $0x30] sm:$0xff] %v2242_v35  ;;  %2659 = vmatmul.msk.bf16.gmra.mxu2 %vm274_vm0, %v1538_v18  ;;  %2687 = vmatmul.msk.bf16.gmra.mxu3 %vm274_vm0, %v1538_v18  ;;  %v4322_v35 = vld [vmem:[#allocation13_spill] sm:$0xff] }
 0x42b   : > { %2356 = vst.msk [vmem:[%s3170_s26 + $0x38] sm:$0xff] %vm2349_vm1, %v2243_v37  ;;  %v4323_v37 = vld [vmem:[#allocation52_spill] sm:$0xff] }
 0x42d   : > { %v1659_v56 = vpop.f32.mrf.mxu2  ;;  %v1808_v20 = vpop.f32.mrf.mxu3 }
 0x42e   : > { %v1660_v19 = vadd.f32 %v1659_v56, %v3455_v42  ;;  %v1809_v13 = vadd.f32 %v1808_v20, %v3457_v16  ;;  %v1959_v45 = vpop.f32.mrf.mxu0  ;;  %v2108_v22 = vpop.f32.mrf.mxu1  ;;  %v4324_v20 = vld [vmem:[#allocation53_spill] sm:$0xff] }
 0x430   : > { %v2244_v47 = vadd.f32 %v1957_v41, %v1660_v19  ;;  %v2245_v36 = vadd.f32 %v2106_v61, %v1809_v13  ;;  %v1497_v41 = vunpack.c.l.b16 %v3495_v17 }
 0x432   : > { %2357 = vst [vmem:[%s3170_s26 + $0x40] sm:$0xff] %v2244_v47  ;;  %v1540_v19 = vpack.c.b16 %v1497_v41, %v1496_v11 }
 0x433   : > { %2358 = vst.msk [vmem:[%s3170_s26 + $0x48] sm:$0xff] %vm2349_vm1, %v2245_v36 }
 0x435   : > { %v1661_v55 = vpop.f32.mrf.mxu2  ;;  %v1810_v1 = vpop.f32.mrf.mxu3 }
 0x436   : > { %v1662_v0 = vadd.f32 %v1661_v55, %v3479_v21  ;;  %v1811_v18 = vadd.f32 %v1810_v1, %v3481_v24  ;;  %v1962_v57 = vpop.f32.mrf.mxu0  ;;  %v2111_v40 = vpop.f32.mrf.mxu1 }
 0x438   : > { %v2246_v42 = vadd.f32 %v1959_v45, %v1662_v0  ;;  %v2247_v2 = vadd.f32 %v2108_v22, %v1811_v18 }
 0x439   : > { %2716 = vmatmul.msk.bf16.gmra.mxu0 %vm274_vm0, %v1539_v52  ;;  %2744 = vmatmul.msk.bf16.gmra.mxu1 %vm274_vm0, %v1539_v52 }
 0x43a   : > { %2359 = vst [vmem:[%s3170_s26 + $0x50] sm:$0xff] %v2246_v42  ;;  %2660 = vmatmul.msk.bf16.gmra.mxu2 %vm274_vm0, %v1539_v52  ;;  %2688 = vmatmul.msk.bf16.gmra.mxu3 %vm274_vm0, %v1539_v52  ;;  %v1500_v52 = vunpack.c.l.b16 %v3255_v6 }
 0x43b   : > { %2360 = vst.msk [vmem:[%s3170_s26 + $0x58] sm:$0xff] %vm2349_vm1, %v2247_v2 }
 0x43d   : > { %v1664_v16 = vpop.f32.mrf.mxu2  ;;  %v1813_v24 = vpop.f32.mrf.mxu3 }
 0x43e   : > { %v1665_v21 = vadd.f32 %v1664_v16, %v3487_v28  ;;  %v1814_v49 = vadd.f32 %v1813_v24, %v3489_v10  ;;  %v1964_v46 = vpop.f32.mrf.mxu0  ;;  %v2113_v15 = vpop.f32.mrf.mxu1  ;;  %v1501_v28 = vunpack.c.l.b16 %v4322_v35  ;;  %v4326_v16 = vld [vmem:[#allocation57_spill] sm:$0xff]  ;;  %v4327_v24 = vld [vmem:[#allocation14_spill] sm:$0xff] }
 0x440   : > { %v2248_v14 = vadd.f32 %v1962_v57, %v1665_v21  ;;  %v2249_v3 = vadd.f32 %v2111_v40, %v1814_v49  ;;  %v3812_v17 = vpack.c.b16 %v1501_v28, %v1500_v52  ;;  %v4325_v40 = vld [vmem:[#allocation56_spill] sm:$0xff]  ;;  %v1499_v21 = vunpack.c.l.b16 %v4326_v16 }
 0x441   : > { %v1498_v2 = vunpack.c.l.b16 %v4325_v40  ;;  %v1502_v49 = vunpack.c.l.b16 %v4327_v24 }
 0x442   : > { %2361 = vst [vmem:[%s3170_s26 + $0x60] sm:$0xff] %v2248_v14 }
 0x443   : > { %2362 = vst.msk [vmem:[%s3170_s26 + $0x68] sm:$0xff] %vm2349_vm1, %v2249_v3  ;;  %v1541_v11 = vpack.c.b16 %v1499_v21, %v1498_v2 }
 0x445   : > { %v1666_v61 = vpop.f32.mrf.mxu2  ;;  %v1815_v56 = vpop.f32.mrf.mxu3 }
 0x446   : > { %v1667_v10 = vadd.f32 %v1666_v61, %v4323_v37  ;;  %v1816_v13 = vadd.f32 %v1815_v56, %v4324_v20  ;;  %v1967_v45 = vpop.f32.mrf.mxu0  ;;  %v2116_v22 = vpop.f32.mrf.mxu1 }
 0x448   : > { %v2250_v47 = vadd.f32 %v1964_v46, %v1667_v10  ;;  %v2251_v53 = vadd.f32 %v2113_v15, %v1816_v13  ;;  %v4328_v46 = vld [vmem:[#allocation15_spill] sm:$0xff]  ;;  %v4329_v15 = vld [vmem:[#allocation62_spill] sm:$0xff] }
 0x449   : > { %2717 = vmatmul.msk.bf16.gmra.mxu0 %vm274_vm0, %v1540_v19  ;;  %2745 = vmatmul.msk.bf16.gmra.mxu1 %vm274_vm0, %v1540_v19 }
 0x44a   : > { %2363 = vst [vmem:[%s3170_s26 + $0x70] sm:$0xff] %v2250_v47  ;;  %2661 = vmatmul.msk.bf16.gmra.mxu2 %vm274_vm0, %v1540_v19  ;;  %2689 = vmatmul.msk.bf16.gmra.mxu3 %vm274_vm0, %v1540_v19 }
 0x44b   : > { %2364 = vst.msk [vmem:[%s3170_s26 + $0x78] sm:$0xff] %vm2349_vm1, %v2251_v53 }
 0x44d   : > { %v1669_v6 = vpop.f32.mrf.mxu2  ;;  %v1818_v55 = vpop.f32.mrf.mxu3 }
 0x44e   : > { %v1670_v36 = vadd.f32 %v1669_v6, %v3521_v38  ;;  %v1819_v0 = vadd.f32 %v1818_v55, %v3523_v29  ;;  %v1969_v1 = vpop.f32.mrf.mxu0  ;;  %v2118_v57 = vpop.f32.mrf.mxu1  ;;  %v1503_v38 = vunpack.c.l.b16 %v4328_v46  ;;  %v4331_v6 = vld [vmem:[#allocation17_spill] sm:$0xff] }
 0x450   : > { %v2252_v18 = vadd.f32 %v1967_v45, %v1670_v36  ;;  %v2253_v42 = vadd.f32 %v2116_v22, %v1819_v0  ;;  %v1543_v37 = vpack.c.b16 %v1503_v38, %v1502_v49  ;;  %v4330_v22 = vld [vmem:[#allocation16_spill] sm:$0xff]  ;;  %v1505_v36 = vunpack.c.l.b16 %v4331_v6  ;;  %v4332_v38 = vld [vmem:[#allocation18_spill] sm:$0xff] }
 0x451   : > { %v1504_v53 = vunpack.c.l.b16 %v4330_v22 }
 0x452   : > { %2365 = vst [vmem:[%s3170_s26 + $0x80] sm:$0xff] %v2252_v18 }
 0x453   : > { %2366 = vst.msk [vmem:[%s3170_s26 + $0x88] sm:$0xff] %vm2349_vm1, %v2253_v42  ;;  %v1544_v40 = vpack.c.b16 %v1505_v36, %v1504_v53 }
 0x455   : > { %v1671_v14 = vpop.f32.mrf.mxu2  ;;  %v1820_v3 = vpop.f32.mrf.mxu3 }
 0x456   : > { %v1672_v29 = vadd.f32 %v1671_v14, %v4329_v15  ;;  %v1821_v41 = vadd.f32 %v1820_v3, %v3547_v12  ;;  %v1972_v52 = vpop.f32.mrf.mxu0  ;;  %v2121_v28 = vpop.f32.mrf.mxu1  ;;  %v1506_v14 = vunpack.c.l.b16 %v4332_v38  ;;  %v4333_v15 = vld [vmem:[#allocation19_spill] sm:$0xff] }
 0x458   : > { %v2254_v35 = vadd.f32 %v1969_v1, %v1672_v29  ;;  %v2255_v61 = vadd.f32 %v2118_v57, %v1821_v41  ;;  %v1507_v29 = vunpack.c.l.b16 %v4333_v15 }
 0x459   : > { %2718 = vmatmul.msk.bf16.gmra.mxu0 %vm274_vm0, %v1541_v11  ;;  %2746 = vmatmul.msk.bf16.gmra.mxu1 %vm274_vm0, %v1541_v11 }
 0x45a   : > { %2367 = vst [vmem:[%s3170_s26 + $0x90] sm:$0xff] %v2254_v35  ;;  %2662 = vmatmul.msk.bf16.gmra.mxu2 %vm274_vm0, %v1541_v11  ;;  %2690 = vmatmul.msk.bf16.gmra.mxu3 %vm274_vm0, %v1541_v11 }
 0x45b   : > { %2368 = vst.msk [vmem:[%s3170_s26 + $0x98] sm:$0xff] %vm2349_vm1, %v2255_v61 }
 0x45d   : > { %v1674_v10 = vpop.f32.mrf.mxu2  ;;  %v1823_v56 = vpop.f32.mrf.mxu3 }
 0x45e   : > { %v1675_v12 = vadd.f32 %v1674_v10, %v3555_v58  ;;  %v1824_v19 = vadd.f32 %v1823_v56, %v3557_v59  ;;  %v1974_v20 = vpop.f32.mrf.mxu0  ;;  %v2123_v45 = vpop.f32.mrf.mxu1 }
 0x460   : > { %v2256_v13 = vadd.f32 %v1972_v52, %v1675_v12  ;;  %v2257_v47 = vadd.f32 %v2121_v28, %v1824_v19  ;;  %v1545_v28 = vpack.c.b16 %v1507_v29, %v1506_v14 }
 0x462   : > { %2369 = vst [vmem:[%s3170_s26 + $0xa0] sm:$0xff] %v2256_v13  ;;  %v4334_v13 = vld [vmem:[#allocation20_spill] sm:$0xff] }
 0x463   : > { %2370 = vst.msk [vmem:[%s3170_s26 + $0xa8] sm:$0xff] %vm2349_vm1, %v2257_v47  ;;  %v4335_v47 = vld [vmem:[#allocation21_spill] sm:$0xff] }
 0x464   : > { %v1509_v22 = vunpack.c.l.b16 %v4335_v47 }
 0x465   : > { %v1676_v55 = vpop.f32.mrf.mxu2  ;;  %v1825_v58 = vpop.f32.mrf.mxu3 }
 0x466   : > { %v1677_v0 = vadd.f32 %v1676_v55, %v3567_v31  ;;  %v1826_v1 = vadd.f32 %v1825_v58, %v3569_v33  ;;  %v1977_v59 = vpop.f32.mrf.mxu0  ;;  %v2126_v57 = vpop.f32.mrf.mxu1 }
 0x468   : > { %v2258_v18 = vadd.f32 %v1974_v20, %v1677_v0  ;;  %v2259_v42 = vadd.f32 %v2123_v45, %v1826_v1  ;;  %v1508_v45 = vunpack.c.l.b16 %v4334_v13  ;;  %v4340_v13 = vld [vmem:[#allocation85_spill] sm:$0xff] }
 0x469   : > { %2719 = vmatmul.msk.bf16.gmra.mxu0 %vm274_vm0, %v3812_v17  ;;  %2747 = vmatmul.msk.bf16.gmra.mxu1 %vm274_vm0, %v3812_v17 }
 0x46a   : > { %2371 = vst [vmem:[%s3170_s26 + $0xb0] sm:$0xff] %v2258_v18  ;;  %2663 = vmatmul.msk.bf16.gmra.mxu2 %vm274_vm0, %v3812_v17  ;;  %2691 = vmatmul.msk.bf16.gmra.mxu3 %vm274_vm0, %v3812_v17  ;;  %v1546_v58 = vpack.c.b16 %v1509_v22, %v1508_v45 }
 0x46b   : > { %2372 = vst.msk [vmem:[%s3170_s26 + $0xb8] sm:$0xff] %vm2349_vm1, %v2259_v42 }
 0x46d   : > { %v1679_v31 = vpop.f32.mrf.mxu2  ;;  %v1828_v2 = vpop.f32.mrf.mxu3 }
 0x46e   : > { %v1680_v33 = vadd.f32 %v1679_v31, %v3577_v39  ;;  %v1829_v16 = vadd.f32 %v1828_v2, %v3579_v60  ;;  %v1979_v21 = vpop.f32.mrf.mxu0  ;;  %v2128_v49 = vpop.f32.mrf.mxu1 }
 0x470   : > { %v2260_v24 = vadd.f32 %v1977_v59, %v1680_v33  ;;  %v2261_v46 = vadd.f32 %v2126_v57, %v1829_v16  ;;  %v4336_v33 = vld [vmem:[#allocation22_spill] sm:$0xff]  ;;  %v4337_v16 = vld [vmem:[#allocation23_spill] sm:$0xff] }
 0x471   : > { %v1510_v2 = vunpack.c.l.b16 %v4336_v33 }
 0x472   : > { %2373 = vst [vmem:[%s3170_s26 + $0xc0] sm:$0xff] %v2260_v24 }
 0x473   : > { %2374 = vst.msk [vmem:[%s3170_s26 + $0xc8] sm:$0xff] %vm2349_vm1, %v2261_v46 }
 0x475   : > { %v1681_v17 = vpop.f32.mrf.mxu2  ;;  %v1830_v39 = vpop.f32.mrf.mxu3 }
 0x476   : > { %v1682_v3 = vadd.f32 %v1681_v17, %v3589_v44  ;;  %v1831_v11 = vadd.f32 %v1830_v39, %v3591_v4  ;;  %v1982_v60 = vpop.f32.mrf.mxu0  ;;  %v2131_v52 = vpop.f32.mrf.mxu1 }
 0x478   : > { %v2262_v41 = vadd.f32 %v1979_v21, %v1682_v3  ;;  %v2263_v35 = vadd.f32 %v2128_v49, %v1831_v11  ;;  %v1511_v21 = vunpack.c.l.b16 %v4337_v16 }
 0x479   : > { %2720 = vmatmul.msk.bf16.gmra.mxu0 %vm274_vm0, %v1543_v37  ;;  %2748 = vmatmul.msk.bf16.gmra.mxu1 %vm274_vm0, %v1543_v37 }
 0x47a   : > { %2375 = vst [vmem:[%s3170_s26 + $0xd0] sm:$0xff] %v2262_v41  ;;  %2664 = vmatmul.msk.bf16.gmra.mxu2 %vm274_vm0, %v1543_v37  ;;  %2692 = vmatmul.msk.bf16.gmra.mxu3 %vm274_vm0, %v1543_v37  ;;  %v1547_v15 = vpack.c.b16 %v1511_v21, %v1510_v2  ;;  %v4338_v41 = vld [vmem:[#allocation24_spill] sm:$0xff] }
 0x47b   : > { %2376 = vst.msk [vmem:[%s3170_s26 + $0xd8] sm:$0xff] %vm2349_vm1, %v2263_v35  ;;  %v4339_v35 = vld [vmem:[#allocation25_spill] sm:$0xff] }
 0x47d   : > { %v1684_v44 = vpop.f32.mrf.mxu2  ;;  %v1833_v61 = vpop.f32.mrf.mxu3 }
 0x47e   : > { %v1685_v4 = vadd.f32 %v1684_v44, %v3599_v43  ;;  %v1834_v10 = vadd.f32 %v1833_v61, %v3601_v25  ;;  %v1984_v12 = vpop.f32.mrf.mxu0  ;;  %v2133_v19 = vpop.f32.mrf.mxu1  ;;  %v1513_v44 = vunpack.c.l.b16 %v4339_v35 }
 0x480   : > { %v2264_v56 = vadd.f32 %v1982_v60, %v1685_v4  ;;  %v2265_v20 = vadd.f32 %v2131_v52, %v1834_v10  ;;  %v1512_v52 = vunpack.c.l.b16 %v4338_v41 }
 0x482   : > { %2377 = vst [vmem:[%s3170_s26 + $0xe0] sm:$0xff] %v2264_v56 }
 0x483   : > { %2378 = vst.msk [vmem:[%s3170_s26 + $0xe8] sm:$0xff] %vm2349_vm1, %v2265_v20 }
 0x485   : > { %v1686_v37 = vpop.f32.mrf.mxu2  ;;  %v1835_v43 = vpop.f32.mrf.mxu3 }
 0x486   : > { %v1687_v53 = vadd.f32 %v1686_v37, %v3611_v62  ;;  %v1836_v6 = vadd.f32 %v1835_v43, %v3613_v54  ;;  %v1987_v25 = vpop.f32.mrf.mxu0  ;;  %v2136_v55 = vpop.f32.mrf.mxu1  ;;  %v4341_v43 = vld [vmem:[#allocation26_spill] sm:$0xff] }
 0x488   : > { %v2266_v36 = vadd.f32 %v1984_v12, %v1687_v53  ;;  %v2267_v0 = vadd.f32 %v2133_v19, %v1836_v6  ;;  %v1548_v19 = vpack.c.b16 %v1513_v44, %v1512_v52  ;;  %v1514_v6 = vunpack.c.l.b16 %v4341_v43  ;;  %v4353_v43 = vld [vmem:[#allocation104_spill] sm:$0xff] }
 0x489   : > { %2721 = vmatmul.msk.bf16.gmra.mxu0 %vm274_vm0, %v1544_v40  ;;  %2749 = vmatmul.msk.bf16.gmra.mxu1 %vm274_vm0, %v1544_v40 }
 0x48a   : > { %2379 = vst [vmem:[%s3170_s26 + $0xf0] sm:$0xff] %v2266_v36  ;;  %2665 = vmatmul.msk.bf16.gmra.mxu2 %vm274_vm0, %v1544_v40  ;;  %2693 = vmatmul.msk.bf16.gmra.mxu3 %vm274_vm0, %v1544_v40 }
 0x48b   : > { %2380 = vst.msk [vmem:[%s3170_s26 + $0xf8] sm:$0xff] %vm2349_vm1, %v2267_v0 }
 0x48d   : > { %v1689_v62 = vpop.f32.mrf.mxu2  ;;  %v1838_v1 = vpop.f32.mrf.mxu3 }
 0x48e   : > { %v1690_v54 = vadd.f32 %v1689_v62, %v3621_v50  ;;  %v1839_v59 = vadd.f32 %v1838_v1, %v3623_v63  ;;  %v1989_v18 = vpop.f32.mrf.mxu0  ;;  %v2138_v42 = vpop.f32.mrf.mxu1 }
 0x490   : > { %v2268_v57 = vadd.f32 %v1987_v25, %v1690_v54  ;;  %v2269_v31 = vadd.f32 %v2136_v55, %v1839_v59  ;;  %v4342_v25 = vld [vmem:[#allocation27_spill] sm:$0xff] }
 0x491   : > { %v1515_v36 = vunpack.c.l.b16 %v4342_v25 }
 0x492   : > { %2381 = vst [vmem:[%s3170_s26 + $0x100] sm:$0xff] %v2268_v57 }
 0x493   : > { %2382 = vst.msk [vmem:[%s3170_s26 + $0x108] sm:$0xff] %vm2349_vm1, %v2269_v31  ;;  %v4344_v31 = vld [vmem:[#allocation91_spill] sm:$0xff] }
 0x495   : > { %v1691_v40 = vpop.f32.mrf.mxu2  ;;  %v1840_v50 = vpop.f32.mrf.mxu3 }
 0x496   : > { %v1692_v24 = vadd.f32 %v1691_v40, %v3633_v32  ;;  %v1841_v49 = vadd.f32 %v1840_v50, %v3635_v51  ;;  %v1992_v63 = vpop.f32.mrf.mxu0  ;;  %v2141_v38 = vpop.f32.mrf.mxu1 }
 0x498   : > { %v2270_v46 = vadd.f32 %v1989_v18, %v1692_v24  ;;  %v2271_v14 = vadd.f32 %v2138_v42, %v1841_v49  ;;  %v1549_v18 = vpack.c.b16 %v1515_v36, %v1514_v6  ;;  %v4345_v24 = vld [vmem:[#allocation28_spill] sm:$0xff]  ;;  %v4346_v49 = vld [vmem:[#allocation29_spill] sm:$0xff] }
 0x499   : > { %2722 = vmatmul.msk.bf16.gmra.mxu0 %vm274_vm0, %v1545_v28  ;;  %2750 = vmatmul.msk.bf16.gmra.mxu1 %vm274_vm0, %v1545_v28  ;;  %v1516_v50 = vunpack.c.l.b16 %v4345_v24 }
 0x49a   : > { %2383 = vst [vmem:[%s3170_s26 + $0x110] sm:$0xff] %v2270_v46  ;;  %2666 = vmatmul.msk.bf16.gmra.mxu2 %vm274_vm0, %v1545_v28  ;;  %2694 = vmatmul.msk.bf16.gmra.mxu3 %vm274_vm0, %v1545_v28 }
 0x49b   : > { %2384 = vst.msk [vmem:[%s3170_s26 + $0x118] sm:$0xff] %vm2349_vm1, %v2271_v14 }
 0x49d   : > { %v1694_v32 = vpop.f32.mrf.mxu2  ;;  %v1843_v29 = vpop.f32.mrf.mxu3 }
 0x49e   : > { %v1695_v51 = vadd.f32 %v1694_v32, %v3643_v23  ;;  %v1844_v17 = vadd.f32 %v1843_v29, %v3645_v30  ;;  %v1994_v3 = vpop.f32.mrf.mxu0  ;;  %v2143_v11 = vpop.f32.mrf.mxu1 }
 0x4a0   : > { %v2272_v39 = vadd.f32 %v1992_v63, %v1695_v51  ;;  %v2273_v60 = vadd.f32 %v2141_v38, %v1844_v17  ;;  %v1517_v63 = vunpack.c.l.b16 %v4346_v49  ;;  %v4359_v49 = vld [vmem:[#allocation33_spill] sm:$0xff] }
 0x4a2   : > { %2385 = vst [vmem:[%s3170_s26 + $0x120] sm:$0xff] %v2272_v39 }
 0x4a3   : > { %2386 = vst.msk [vmem:[%s3170_s26 + $0x128] sm:$0xff] %vm2349_vm1, %v2273_v60  ;;  %v4348_v60 = vld [vmem:[#allocation97_spill] sm:$0xff] }
 0x4a5   : > { %v1696_v28 = vpop.f32.mrf.mxu2  ;;  %v1845_v23 = vpop.f32.mrf.mxu3 }
 0x4a6   : > { %v1697_v4 = vadd.f32 %v1696_v28, %v3655_v5  ;;  %v1846_v61 = vadd.f32 %v1845_v23, %v3657_v8  ;;  %v1997_v30 = vpop.f32.mrf.mxu0  ;;  %v2146_v12 = vpop.f32.mrf.mxu1 }
 0x4a8   : > { %v2274_v10 = vadd.f32 %v1994_v3, %v1697_v4  ;;  %v2275_v56 = vadd.f32 %v2143_v11, %v1846_v61  ;;  %v1550_v3 = vpack.c.b16 %v1517_v63, %v1516_v50  ;;  %v4349_v4 = vld [vmem:[#allocation30_spill] sm:$0xff]  ;;  %v4350_v61 = vld [vmem:[#allocation31_spill] sm:$0xff] }
 0x4a9   : > { %2723 = vmatmul.msk.bf16.gmra.mxu0 %vm274_vm0, %v1546_v58  ;;  %2751 = vmatmul.msk.bf16.gmra.mxu1 %vm274_vm0, %v1546_v58  ;;  %v1518_v23 = vunpack.c.l.b16 %v4349_v4 }
 0x4aa   : > { %2387 = vst [vmem:[%s3170_s26 + $0x130] sm:$0xff] %v2274_v10  ;;  %2667 = vmatmul.msk.bf16.gmra.mxu2 %vm274_vm0, %v1546_v58  ;;  %2695 = vmatmul.msk.bf16.gmra.mxu3 %vm274_vm0, %v1546_v58 }
 0x4ab   : > { %2388 = vst.msk [vmem:[%s3170_s26 + $0x138] sm:$0xff] %vm2349_vm1, %v2275_v56 }
 0x4ad   : > { %v1699_v5 = vpop.f32.mrf.mxu2  ;;  %v1848_v20 = vpop.f32.mrf.mxu3 }
 0x4ae   : > { %v1700_v8 = vadd.f32 %v1699_v5, %v3665_v7  ;;  %v1849_v45 = vadd.f32 %v1848_v20, %v4340_v13  ;;  %v1999_v47 = vpop.f32.mrf.mxu0  ;;  %v2148_v37 = vpop.f32.mrf.mxu1 }
 0x4b0   : > { %v2276_v22 = vadd.f32 %v1997_v30, %v1700_v8  ;;  %v2277_v53 = vadd.f32 %v2146_v12, %v1849_v45  ;;  %v1519_v30 = vunpack.c.l.b16 %v4350_v61 }
 0x4b2   : > { %2389 = vst [vmem:[%s3170_s26 + $0x140] sm:$0xff] %v2276_v22  ;;  %v4352_v22 = vld [vmem:[#allocation103_spill] sm:$0xff] }
 0x4b3   : > { %2390 = vst.msk [vmem:[%s3170_s26 + $0x148] sm:$0xff] %vm2349_vm1, %v2277_v53 }
 0x4b5   : > { %v1701_v55 = vpop.f32.mrf.mxu2  ;;  %v1850_v7 = vpop.f32.mrf.mxu3 }
 0x4b6   : > { %v1702_v0 = vadd.f32 %v1701_v55, %v3677_v34  ;;  %v1851_v58 = vadd.f32 %v1850_v7, %v3679_v26  ;;  %v2002_v62 = vpop.f32.mrf.mxu0  ;;  %v2151_v1 = vpop.f32.mrf.mxu1  ;;  %v4343_v26 = vld [vmem:[#allocation90_spill] sm:$0xff]  ;;  %v4354_v7 = vld [vmem:[#allocation36_spill] sm:$0xff] }
 0x4b8   : > { %v2278_v54 = vadd.f32 %v1999_v47, %v1702_v0  ;;  %v2279_v59 = vadd.f32 %v2148_v37, %v1851_v58  ;;  %v1551_v47 = vpack.c.b16 %v1519_v30, %v1518_v23  ;;  %v1520_v58 = vunpack.c.l.b16 %v4354_v7  ;;  %v4364_v23 = vld [vmem:[#allocation38_spill] sm:$0xff]  ;;  %v4369_v7 = vld [vmem:[#allocation45_spill] sm:$0xff] }
 0x4b9   : > { %2724 = vmatmul.msk.bf16.gmra.mxu0 %vm274_vm0, %v1547_v15  ;;  %2752 = vmatmul.msk.bf16.gmra.mxu1 %vm274_vm0, %v1547_v15 }
 0x4ba   : > { %2391 = vst [vmem:[%s3170_s26 + $0x150] sm:$0xff] %v2278_v54  ;;  %2668 = vmatmul.msk.bf16.gmra.mxu2 %vm274_vm0, %v1547_v15  ;;  %2696 = vmatmul.msk.bf16.gmra.mxu3 %vm274_vm0, %v1547_v15 }
 0x4bb   : > { %2392 = vst.msk [vmem:[%s3170_s26 + $0x158] sm:$0xff] %vm2349_vm1, %v2279_v59  ;;  %v4356_v59 = vld [vmem:[#allocation107_spill] sm:$0xff] }
 0x4bd   : > { %v1704_v34 = vpop.f32.mrf.mxu2  ;;  %v1853_v42 = vpop.f32.mrf.mxu3 }
 0x4be   : > { %v1705_v57 = vadd.f32 %v1704_v34, %v4343_v26  ;;  %v1854_v33 = vadd.f32 %v1853_v42, %v4344_v31  ;;  %v2004_v2 = vpop.f32.mrf.mxu0  ;;  %v2153_v21 = vpop.f32.mrf.mxu1  ;;  %v4357_v26 = vld [vmem:[#allocation108_spill] sm:$0xff] }
 0x4c0   : > { %v2280_v16 = vadd.f32 %v2002_v62, %v1705_v57  ;;  %v2281_v40 = vadd.f32 %v2151_v1, %v1854_v33  ;;  %v4355_v62 = vld [vmem:[#allocation37_spill] sm:$0xff] }
 0x4c1   : > { %v1521_v54 = vunpack.c.l.b16 %v4355_v62 }
 0x4c2   : > { %2393 = vst [vmem:[%s3170_s26 + $0x160] sm:$0xff] %v2280_v16 }
 0x4c3   : > { %2394 = vst.msk [vmem:[%s3170_s26 + $0x168] sm:$0xff] %vm2349_vm1, %v2281_v40  ;;  %v1552_v16 = vpack.c.b16 %v1521_v54, %v1520_v58  ;;  %v4358_v40 = vld [vmem:[#allocation32_spill] sm:$0xff] }
 0x4c5   : > { %v1706_v46 = vpop.f32.mrf.mxu2  ;;  %v1855_v14 = vpop.f32.mrf.mxu3 }
 0x4c6   : > { %v1707_v38 = vadd.f32 %v1706_v46, %v3699_v9  ;;  %v1856_v15 = vadd.f32 %v1855_v14, %v3701_v48  ;;  %v2007_v32 = vpop.f32.mrf.mxu0  ;;  %v2156_v29 = vpop.f32.mrf.mxu1  ;;  %v4347_v48 = vld [vmem:[#allocation96_spill] sm:$0xff] }
 0x4c8   : > { %v2282_v51 = vadd.f32 %v2004_v2, %v1707_v38  ;;  %v2283_v17 = vadd.f32 %v2153_v21, %v1856_v15 }
 0x4c9   : > { %2725 = vmatmul.msk.bf16.gmra.mxu0 %vm274_vm0, %v1548_v19  ;;  %2753 = vmatmul.msk.bf16.gmra.mxu1 %vm274_vm0, %v1548_v19 }
 0x4ca   : > { %2395 = vst [vmem:[%s3170_s26 + $0x170] sm:$0xff] %v2282_v51  ;;  %2669 = vmatmul.msk.bf16.gmra.mxu2 %vm274_vm0, %v1548_v19  ;;  %2697 = vmatmul.msk.bf16.gmra.mxu3 %vm274_vm0, %v1548_v19  ;;  %v4351_v19 = vld [vmem:[#allocation100_spill] sm:$0xff] }
 0x4cb   : > { %2396 = vst.msk [vmem:[%s3170_s26 + $0x178] sm:$0xff] %vm2349_vm1, %v2283_v17 }
 0x4cd   : > { %v1709_v9 = vpop.f32.mrf.mxu2  ;;  %v1858_v11 = vpop.f32.mrf.mxu3 }
 0x4ce   : > { %v1710_v39 = vadd.f32 %v1709_v9, %v4347_v48  ;;  %v1859_v41 = vadd.f32 %v1858_v11, %v4348_v60  ;;  %v2009_v52 = vpop.f32.mrf.mxu0  ;;  %v2158_v44 = vpop.f32.mrf.mxu1  ;;  %v4362_v9 = vld [vmem:[#allocation34_spill] sm:$0xff]  ;;  %v4363_v11 = vld [vmem:[#allocation35_spill] sm:$0xff] }
 0x4d0   : > { %v2284_v35 = vadd.f32 %v2007_v32, %v1710_v39  ;;  %v2285_v28 = vadd.f32 %v2156_v29, %v1859_v41  ;;  %v4360_v32 = vld [vmem:[#allocation42_spill] sm:$0xff]  ;;  %v4361_v29 = vld [vmem:[#allocation43_spill] sm:$0xff] }
 0x4d1   : > { %v1522_v51 = vunpack.c.l.b16 %v4360_v32  ;;  %v1523_v17 = vunpack.c.l.b16 %v4361_v29 }
 0x4d2   : > { %2397 = vst [vmem:[%s3170_s26 + $0x180] sm:$0xff] %v2284_v35 }
 0x4d3   : > { %2398 = vst.msk [vmem:[%s3170_s26 + $0x188] sm:$0xff] %vm2349_vm1, %v2285_v28  ;;  %v1553_v28 = vpack.c.b16 %v1523_v17, %v1522_v51  ;;  %v4374_v51 = vld [vmem:[#allocation48_spill] sm:$0xff]  ;;  %v4375_v17 = vld [vmem:[#allocation49_spill] sm:$0xff] }
 0x4d4   : > { %v1524_v29 = vunpack.c.l.b16 %v4374_v51  ;;  %v4389_v51 = vld [vmem:[#allocation70_spill] sm:$0xff] }
 0x4d5   : > { %v1711_v10 = vpop.f32.mrf.mxu2  ;;  %v1860_v56 = vpop.f32.mrf.mxu3 }
 0x4d6   : > { %v1712_v12 = vadd.f32 %v1711_v10, %v3721_v27  ;;  %v1861_v5 = vadd.f32 %v1860_v56, %v4351_v19  ;;  %v2012_v8 = vpop.f32.mrf.mxu0  ;;  %v2161_v13 = vpop.f32.mrf.mxu1  ;;  %v4365_v10 = vld [vmem:[#allocation39_spill] sm:$0xff] }
 0x4d8   : > { %v2286_v20 = vadd.f32 %v2009_v52, %v1712_v12  ;;  %v2287_v45 = vadd.f32 %v2158_v44, %v1861_v5 }
 0x4d9   : > { %2726 = vmatmul.msk.bf16.gmra.mxu0 %vm274_vm0, %v1549_v18  ;;  %2754 = vmatmul.msk.bf16.gmra.mxu1 %vm274_vm0, %v1549_v18 }
 0x4da   : > { %2399 = vst [vmem:[%s3170_s26 + $0x190] sm:$0xff] %v2286_v20  ;;  %2670 = vmatmul.msk.bf16.gmra.mxu2 %vm274_vm0, %v1549_v18  ;;  %2698 = vmatmul.msk.bf16.gmra.mxu3 %vm274_vm0, %v1549_v18 }
 0x4db   : > { %2400 = vst.msk [vmem:[%s3170_s26 + $0x198] sm:$0xff] %vm2349_vm1, %v2287_v45 }
 0x4dd   : > { %v1714_v27 = vpop.f32.mrf.mxu2  ;;  %v1863_v53 = vpop.f32.mrf.mxu3 }
 0x4de   : > { %v1715_v37 = vadd.f32 %v1714_v27, %v4352_v22  ;;  %v1864_v6 = vadd.f32 %v1863_v53, %v4353_v43  ;;  %v2014_v25 = vpop.f32.mrf.mxu0  ;;  %v2163_v55 = vpop.f32.mrf.mxu1 }
 0x4e0   : > { %v2288_v36 = vadd.f32 %v2012_v8, %v1715_v37  ;;  %v2289_v0 = vadd.f32 %v2161_v13, %v1864_v6  ;;  %v4366_v13 = vld [vmem:[#allocation40_spill] sm:$0xff] }
 0x4e2   : > { %2401 = vst [vmem:[%s3170_s26 + $0x1a0] sm:$0xff] %v2288_v36  ;;  %v4368_v36 = vld [vmem:[#allocation44_spill] sm:$0xff] }
 0x4e3   : > { %2402 = vst.msk [vmem:[%s3170_s26 + $0x1a8] sm:$0xff] %vm2349_vm1, %v2289_v0 }
 0x4e5   : > { %v1716_v1 = vpop.f32.mrf.mxu2  ;;  %v1865_v34 = vpop.f32.mrf.mxu3 }
 0x4e6   : > { %v1717_v18 = vadd.f32 %v1716_v1, %v4356_v59  ;;  %v1866_v57 = vadd.f32 %v1865_v34, %v4357_v26  ;;  %v2017_v42 = vpop.f32.mrf.mxu0  ;;  %v2166_v33 = vpop.f32.mrf.mxu1  ;;  %v4370_v34 = vld [vmem:[#allocation46_spill] sm:$0xff] }
 0x4e8   : > { %v2290_v31 = vadd.f32 %v2014_v25, %v1717_v18  ;;  %v2291_v2 = vadd.f32 %v2163_v55, %v1866_v57 }
 0x4e9   : > { %2727 = vmatmul.msk.bf16.gmra.mxu0 %vm274_vm0, %v1550_v3  ;;  %2755 = vmatmul.msk.bf16.gmra.mxu1 %vm274_vm0, %v1550_v3 }
 0x4ea   : > { %2403 = vst [vmem:[%s3170_s26 + $0x1b0] sm:$0xff] %v2290_v31  ;;  %2671 = vmatmul.msk.bf16.gmra.mxu2 %vm274_vm0, %v1550_v3  ;;  %2699 = vmatmul.msk.bf16.gmra.mxu3 %vm274_vm0, %v1550_v3 }
 0x4eb   : > { %2404 = vst.msk [vmem:[%s3170_s26 + $0x1b8] sm:$0xff] %vm2349_vm1, %v2291_v2 }
 0x4ed   : > { %v1719_v21 = vpop.f32.mrf.mxu2  ;;  %v1868_v50 = vpop.f32.mrf.mxu3 }
 0x4ee   : > { %v1720_v24 = vadd.f32 %v1719_v21, %v4358_v40  ;;  %v1869_v63 = vadd.f32 %v1868_v50, %v4359_v49  ;;  %v2019_v46 = vpop.f32.mrf.mxu0  ;;  %v2168_v14 = vpop.f32.mrf.mxu1 }
 0x4f0   : > { %v2292_v38 = vadd.f32 %v2017_v42, %v1720_v24  ;;  %v2293_v15 = vadd.f32 %v2166_v33, %v1869_v63  ;;  %v4371_v42 = vld [vmem:[#allocation47_spill] sm:$0xff]  ;;  %v4372_v24 = vld [vmem:[#allocation50_spill] sm:$0xff] }
 0x4f1   : > { %v4373_v63 = vld [vmem:[#allocation51_spill] sm:$0xff] }
 0x4f2   : > { %2405 = vst [vmem:[%s3170_s26 + $0x1c0] sm:$0xff] %v2292_v38 }
 0x4f3   : > { %2406 = vst.msk [vmem:[%s3170_s26 + $0x1c8] sm:$0xff] %vm2349_vm1, %v2293_v15 }
 0x4f5   : > { %v1721_v3 = vpop.f32.mrf.mxu2  ;;  %v1870_v39 = vpop.f32.mrf.mxu3 }
 0x4f6   : > { %v1722_v48 = vadd.f32 %v1721_v3, %v4362_v9  ;;  %v1871_v60 = vadd.f32 %v1870_v39, %v4363_v11  ;;  %v2022_v41 = vpop.f32.mrf.mxu0  ;;  %v2171_v35 = vpop.f32.mrf.mxu1  ;;  %v1525_v3 = vunpack.c.l.b16 %v4375_v17 }
 0x4f8   : > { %v2294_v52 = vadd.f32 %v2019_v46, %v1722_v48  ;;  %v2295_v44 = vadd.f32 %v2168_v14, %v1871_v60  ;;  %v4376_v48 = vld [vmem:[#allocation54_spill] sm:$0xff]  ;;  %v1554_v60 = vpack.c.b16 %v1525_v3, %v1524_v29 }
 0x4f9   : > { %2728 = vmatmul.msk.bf16.gmra.mxu0 %vm274_vm0, %v1551_v47  ;;  %2756 = vmatmul.msk.bf16.gmra.mxu1 %vm274_vm0, %v1551_v47 }
 0x4fa   : > { %2407 = vst [vmem:[%s3170_s26 + $0x1d0] sm:$0xff] %v2294_v52  ;;  %2672 = vmatmul.msk.bf16.gmra.mxu2 %vm274_vm0, %v1551_v47  ;;  %2700 = vmatmul.msk.bf16.gmra.mxu3 %vm274_vm0, %v1551_v47  ;;  %v4367_v47 = vld [vmem:[#allocation41_spill] sm:$0xff] }
 0x4fb   : > { %2408 = vst.msk [vmem:[%s3170_s26 + $0x1d8] sm:$0xff] %vm2349_vm1, %v2295_v44 }
 0x4fd   : > { %v1724_v4 = vpop.f32.mrf.mxu2  ;;  %v1873_v30 = vpop.f32.mrf.mxu3 }
 0x4fe   : > { %v1725_v61 = vadd.f32 %v1724_v4, %v4364_v23  ;;  %v1874_v12 = vadd.f32 %v1873_v30, %v4365_v10  ;;  %v2024_v56 = vpop.f32.mrf.mxu0  ;;  %v2173_v5 = vpop.f32.mrf.mxu1 }
 0x500   : > { %v2296_v19 = vadd.f32 %v2022_v41, %v1725_v61  ;;  %v2297_v8 = vadd.f32 %v2171_v35, %v1874_v12  ;;  %v4377_v41 = vld [vmem:[#allocation55_spill] sm:$0xff]  ;;  %v4378_v61 = vld [vmem:[#allocation60_spill] sm:$0xff]  ;;  %v4379_v12 = vld [vmem:[#allocation61_spill] sm:$0xff] }
 0x502   : > { %2409 = vst [vmem:[%s3170_s26 + $0x1e0] sm:$0xff] %v2296_v19 }
 0x503   : > { %2410 = vst.msk [vmem:[%s3170_s26 + $0x1e8] sm:$0xff] %vm2349_vm1, %v2297_v8 }
 0x505   : > { %v1726_v20 = vpop.f32.mrf.mxu2  ;;  %v1875_v27 = vpop.f32.mrf.mxu3 }
 0x506   : > { %v1727_v45 = vadd.f32 %v1726_v20, %v4366_v13  ;;  %v1876_v22 = vadd.f32 %v1875_v27, %v4367_v47  ;;  %v2027_v37 = vpop.f32.mrf.mxu0  ;;  %v2176_v43 = vpop.f32.mrf.mxu1  ;;  %v4380_v13 = vld [vmem:[#allocation58_spill] sm:$0xff]  ;;  %v4381_v27 = vld [vmem:[#allocation59_spill] sm:$0xff] }
 0x507   : > { %v1527_v47 = vunpack.c.l.b16 %v4381_v27  ;;  %v4394_v27 = vld [vmem:[#allocation75_spill] sm:$0xff] }
 0x508   : > { %v2298_v53 = vadd.f32 %v2024_v56, %v1727_v45  ;;  %v2299_v6 = vadd.f32 %v2173_v5, %v1876_v22  ;;  %v1526_v45 = vunpack.c.l.b16 %v4380_v13 }
 0x509   : > { %2729 = vmatmul.msk.bf16.gmra.mxu0 %vm274_vm0, %v1552_v16  ;;  %2757 = vmatmul.msk.bf16.gmra.mxu1 %vm274_vm0, %v1552_v16 }
 0x50a   : > { %2411 = vst [vmem:[%s3170_s26 + $0x1f0] sm:$0xff] %v2298_v53  ;;  %2673 = vmatmul.msk.bf16.gmra.mxu2 %vm274_vm0, %v1552_v16  ;;  %2701 = vmatmul.msk.bf16.gmra.mxu3 %vm274_vm0, %v1552_v16 }
 0x50b   : > { %2412 = vst.msk [vmem:[%s3170_s26 + $0x1f8] sm:$0xff] %vm2349_vm1, %v2299_v6  ;;  %v1555_v6 = vpack.c.b16 %v1527_v47, %v1526_v45 }
 0x50d   : > { %v1729_v25 = vpop.f32.mrf.mxu2  ;;  %v1878_v0 = vpop.f32.mrf.mxu3 }
 0x50e   : > { %v1730_v55 = vadd.f32 %v1729_v25, %v4368_v36  ;;  %v1879_v58 = vadd.f32 %v1878_v0, %v4369_v7  ;;  %v2029_v62 = vpop.f32.mrf.mxu0  ;;  %v2178_v1 = vpop.f32.mrf.mxu1  ;;  %v4383_v25 = vld [vmem:[#allocation64_spill] sm:$0xff] }
 0x510   : > { %v2300_v54 = vadd.f32 %v2027_v37, %v1730_v55  ;;  %v2301_v59 = vadd.f32 %v2176_v43, %v1879_v58  ;;  %v4382_v37 = vld [vmem:[#allocation63_spill] sm:$0xff] }
 0x512   : > { %2413 = vst [vmem:[%s3170_s26 + $0x200] sm:$0xff] %v2300_v54  ;;  %v4384_v54 = vld [vmem:[#allocation65_spill] sm:$0xff] }
 0x513   : > { %2414 = vst.msk [vmem:[%s3170_s26 + $0x208] sm:$0xff] %vm2349_vm1, %v2301_v59 }
 0x515   : > { %v1731_v18 = vpop.f32.mrf.mxu2  ;;  %v1880_v57 = vpop.f32.mrf.mxu3 }
 0x516   : > { %v1732_v26 = vadd.f32 %v1731_v18, %v4370_v34  ;;  %v1881_v31 = vadd.f32 %v1880_v57, %v4371_v42  ;;  %v2032_v33 = vpop.f32.mrf.mxu0  ;;  %v2181_v16 = vpop.f32.mrf.mxu1  ;;  %v4385_v18 = vld [vmem:[#allocation66_spill] sm:$0xff] }
 0x518   : > { %v2302_v2 = vadd.f32 %v2029_v62, %v1732_v26  ;;  %v2303_v21 = vadd.f32 %v2178_v1, %v1881_v31 }
 0x519   : > { %2730 = vmatmul.msk.bf16.gmra.mxu0 %vm274_vm0, %v1553_v28  ;;  %2758 = vmatmul.msk.bf16.gmra.mxu1 %vm274_vm0, %v1553_v28 }
 0x51a   : > { %2415 = vst [vmem:[%s3170_s26 + $0x210] sm:$0xff] %v2302_v2  ;;  %2674 = vmatmul.msk.bf16.gmra.mxu2 %vm274_vm0, %v1553_v28  ;;  %2702 = vmatmul.msk.bf16.gmra.mxu3 %vm274_vm0, %v1553_v28  ;;  %v4386_v2 = vld [vmem:[#allocation67_spill] sm:$0xff] }
 0x51b   : > { %2416 = vst.msk [vmem:[%s3170_s26 + $0x218] sm:$0xff] %vm2349_vm1, %v2303_v21 }
 0x51d   : > { %v1734_v40 = vpop.f32.mrf.mxu2  ;;  %v1883_v49 = vpop.f32.mrf.mxu3 }
 0x51e   : > { %v1735_v50 = vadd.f32 %v1734_v40, %v4372_v24  ;;  %v1884_v46 = vadd.f32 %v1883_v49, %v4373_v63  ;;  %v2034_v38 = vpop.f32.mrf.mxu0  ;;  %v2183_v15 = vpop.f32.mrf.mxu1  ;;  %v4387_v40 = vld [vmem:[#allocation68_spill] sm:$0xff] }
 0x520   : > { %v2304_v14 = vadd.f32 %v2032_v33, %v1735_v50  ;;  %v2305_v32 = vadd.f32 %v2181_v16, %v1884_v46 }
 0x522   : > { %2417 = vst [vmem:[%s3170_s26 + $0x220] sm:$0xff] %v2304_v14  ;;  %v4388_v14 = vld [vmem:[#allocation69_spill] sm:$0xff] }
 0x523   : > { %2418 = vst.msk [vmem:[%s3170_s26 + $0x228] sm:$0xff] %vm2349_vm1, %v2305_v32 }
 0x525   : > { %v1736_v9 = vpop.f32.mrf.mxu2  ;;  %v1885_v11 = vpop.f32.mrf.mxu3 }
 0x526   : > { %v1737_v39 = vadd.f32 %v1736_v9, %v4376_v48  ;;  %v1886_v52 = vadd.f32 %v1885_v11, %v4377_v41  ;;  %v2037_v35 = vpop.f32.mrf.mxu0  ;;  %v2186_v28 = vpop.f32.mrf.mxu1  ;;  %v4390_v11 = vld [vmem:[#allocation71_spill] sm:$0xff] }
 0x528   : > { %v2306_v44 = vadd.f32 %v2034_v38, %v1737_v39  ;;  %v2307_v4 = vadd.f32 %v2183_v15, %v1886_v52  ;;  %v4391_v52 = vld [vmem:[#allocation72_spill] sm:$0xff] }
 0x529   : > { %2731 = vmatmul.msk.bf16.gmra.mxu0 %vm274_vm0, %v1554_v60  ;;  %2759 = vmatmul.msk.bf16.gmra.mxu1 %vm274_vm0, %v1554_v60 }
 0x52a   : > { %2419 = vst [vmem:[%s3170_s26 + $0x230] sm:$0xff] %v2306_v44  ;;  %2675 = vmatmul.msk.bf16.gmra.mxu2 %vm274_vm0, %v1554_v60  ;;  %2703 = vmatmul.msk.bf16.gmra.mxu3 %vm274_vm0, %v1554_v60 }
 0x52b   : > { %2420 = vst.msk [vmem:[%s3170_s26 + $0x238] sm:$0xff] %vm2349_vm1, %v2307_v4 }
 0x52d   : > { %v1739_v23 = vpop.f32.mrf.mxu2  ;;  %v1888_v10 = vpop.f32.mrf.mxu3 }
 0x52e   : > { %v1740_v30 = vadd.f32 %v1739_v23, %v4378_v61  ;;  %v1889_v56 = vadd.f32 %v1888_v10, %v4379_v12  ;;  %v2039_v19 = vpop.f32.mrf.mxu0  ;;  %v2188_v8 = vpop.f32.mrf.mxu1 }
 0x530   : > { %v2308_v5 = vadd.f32 %v2037_v35, %v1740_v30  ;;  %v2309_v20 = vadd.f32 %v2186_v28, %v1889_v56  ;;  %v4392_v30 = vld [vmem:[#allocation73_spill] sm:$0xff]  ;;  %v4393_v56 = vld [vmem:[#allocation74_spill] sm:$0xff] }
 0x532   : > { %2421 = vst [vmem:[%s3170_s26 + $0x240] sm:$0xff] %v2308_v5 }
 0x533   : > { %2422 = vst.msk [vmem:[%s3170_s26 + $0x248] sm:$0xff] %vm2349_vm1, %v2309_v20 }
 0x535   : > { %v1741_v22 = vpop.f32.mrf.mxu2  ;;  %v1890_v43 = vpop.f32.mrf.mxu3 }
 0x536   : > { %v1742_v53 = vadd.f32 %v1741_v22, %v4382_v37  ;;  %v1891_v36 = vadd.f32 %v1890_v43, %v4383_v25  ;;  %v2042_v55 = vpop.f32.mrf.mxu0  ;;  %v2191_v7 = vpop.f32.mrf.mxu1  ;;  %v4395_v37 = vld [vmem:[#allocation76_spill] sm:$0xff] }
 0x538   : > { %v2310_v0 = vadd.f32 %v2039_v19, %v1742_v53  ;;  %v2311_v58 = vadd.f32 %v2188_v8, %v1891_v36 }
 0x539   : > { %2732 = vmatmul.msk.bf16.gmra.mxu0 %vm274_vm0, %v1555_v6  ;;  %2760 = vmatmul.msk.bf16.gmra.mxu1 %vm274_vm0, %v1555_v6 }
 0x53a   : > { %2423 = vst [vmem:[%s3170_s26 + $0x250] sm:$0xff] %v2310_v0  ;;  %2676 = vmatmul.msk.bf16.gmra.mxu2 %vm274_vm0, %v1555_v6  ;;  %2704 = vmatmul.msk.bf16.gmra.mxu3 %vm274_vm0, %v1555_v6  ;;  %v4396_v0 = vld [vmem:[#allocation77_spill] sm:$0xff] }
 0x53b   : > { %2424 = vst.msk [vmem:[%s3170_s26 + $0x258] sm:$0xff] %vm2349_vm1, %v2311_v58 }
 0x53d   : > { %v1744_v62 = vpop.f32.mrf.mxu2  ;;  %v1893_v59 = vpop.f32.mrf.mxu3 }
 0x53e   : > { %v1745_v1 = vadd.f32 %v1744_v62, %v4384_v54  ;;  %v1894_v34 = vadd.f32 %v1893_v59, %v4385_v18  ;;  %v2044_v26 = vpop.f32.mrf.mxu0  ;;  %v2193_v42 = vpop.f32.mrf.mxu1  ;;  %v4397_v62 = vld [vmem:[#allocation78_spill] sm:$0xff] }
 0x540   : > { %v2312_v57 = vadd.f32 %v2042_v55, %v1745_v1  ;;  %v2313_v31 = vadd.f32 %v2191_v7, %v1894_v34 }
 0x542   : > { %2425 = vst [vmem:[%s3170_s26 + $0x260] sm:$0xff] %v2312_v57  ;;  %v4398_v57 = vld [vmem:[#allocation79_spill] sm:$0xff] }
 0x543   : > { %2426 = vst.msk [vmem:[%s3170_s26 + $0x268] sm:$0xff] %vm2349_vm1, %v2313_v31 }
 0x545   : > { %v1746_v33 = vpop.f32.mrf.mxu2  ;;  %v1895_v21 = vpop.f32.mrf.mxu3 }
 0x546   : > { %v1747_v16 = vadd.f32 %v1746_v33, %v4386_v2  ;;  %v1896_v24 = vadd.f32 %v1895_v21, %v4387_v40  ;;  %v2047_v50 = vpop.f32.mrf.mxu0  ;;  %v2196_v63 = vpop.f32.mrf.mxu1  ;;  %v4399_v33 = vld [vmem:[#allocation80_spill] sm:$0xff] }
 0x548   : > { %v2314_v49 = vadd.f32 %v2044_v26, %v1747_v16  ;;  %v2315_v46 = vadd.f32 %v2193_v42, %v1896_v24 }
 0x54a   : > { %2427 = vst [vmem:[%s3170_s26 + $0x270] sm:$0xff] %v2314_v49  ;;  %v4400_v49 = vld [vmem:[#allocation81_spill] sm:$0xff] }
 0x54b   : > { %2428 = vst.msk [vmem:[%s3170_s26 + $0x278] sm:$0xff] %vm2349_vm1, %v2315_v46 }
 0x54d   : > { %v1749_v38 = vpop.f32.mrf.mxu2  ;;  %v1898_v32 = vpop.f32.mrf.mxu3 }
 0x54e   : > { %v1750_v15 = vadd.f32 %v1749_v38, %v4388_v14  ;;  %v1899_v29 = vadd.f32 %v1898_v32, %v4389_v51  ;;  %v2049_v17 = vpop.f32.mrf.mxu0  ;;  %v2198_v9 = vpop.f32.mrf.mxu1  ;;  %v4401_v38 = vld [vmem:[#allocation82_spill] sm:$0xff] }
 0x550   : > { %v2316_v3 = vadd.f32 %v2047_v50, %v1750_v15  ;;  %v2317_v48 = vadd.f32 %v2196_v63, %v1899_v29 }
 0x552   : > { %2429 = vst [vmem:[%s3170_s26 + $0x280] sm:$0xff] %v2316_v3  ;;  %v4402_v3 = vld [vmem:[#allocation83_spill] sm:$0xff] }
 0x553   : > { %2430 = vst.msk [vmem:[%s3170_s26 + $0x288] sm:$0xff] %vm2349_vm1, %v2317_v48 }
 0x555   : > { %v1751_v39 = vpop.f32.mrf.mxu2  ;;  %v1900_v41 = vpop.f32.mrf.mxu3 }
 0x556   : > { %v1752_v60 = vadd.f32 %v1751_v39, %v4390_v11  ;;  %v1901_v35 = vadd.f32 %v1900_v41, %v4391_v52  ;;  %v2052_v44 = vpop.f32.mrf.mxu0  ;;  %v2201_v4 = vpop.f32.mrf.mxu1  ;;  %v4403_v39 = vld [vmem:[#allocation84_spill] sm:$0xff] }
 0x558   : > { %v2318_v28 = vadd.f32 %v2049_v17, %v1752_v60  ;;  %v2319_v23 = vadd.f32 %v2198_v9, %v1901_v35 }
 0x55a   : > { %2431 = vst [vmem:[%s3170_s26 + $0x290] sm:$0xff] %v2318_v28  ;;  %v4404_v28 = vld [vmem:[#allocation86_spill] sm:$0xff] }
 0x55b   : > { %2432 = vst.msk [vmem:[%s3170_s26 + $0x298] sm:$0xff] %vm2349_vm1, %v2319_v23 }
 0x55d   : > { %v1754_v61 = vpop.f32.mrf.mxu2  ;;  %v1903_v12 = vpop.f32.mrf.mxu3 }
 0x55e   : > { %v1755_v10 = vadd.f32 %v1754_v61, %v4392_v30  ;;  %v1904_v19 = vadd.f32 %v1903_v12, %v4393_v56  ;;  %v2054_v5 = vpop.f32.mrf.mxu0  ;;  %v2203_v20 = vpop.f32.mrf.mxu1  ;;  %v4405_v61 = vld [vmem:[#allocation87_spill] sm:$0xff] }
 0x560   : > { %v2320_v8 = vadd.f32 %v2052_v44, %v1755_v10  ;;  %v2321_v13 = vadd.f32 %v2201_v4, %v1904_v19 }
 0x562   : > { %2433 = vst [vmem:[%s3170_s26 + $0x2a0] sm:$0xff] %v2320_v8  ;;  %v4406_v8 = vld [vmem:[#allocation88_spill] sm:$0xff] }
 0x563   : > { %2434 = vst.msk [vmem:[%s3170_s26 + $0x2a8] sm:$0xff] %vm2349_vm1, %v2321_v13 }
 0x565   : > { %v1756_v45 = vpop.f32.mrf.mxu2  ;;  %v1905_v22 = vpop.f32.mrf.mxu3 }
 0x566   : > { %v1757_v47 = vadd.f32 %v1756_v45, %v4394_v27  ;;  %v1906_v53 = vadd.f32 %v1905_v22, %v4395_v37  ;;  %v2057_v43 = vpop.f32.mrf.mxu0  ;;  %v2206_v25 = vpop.f32.mrf.mxu1  ;;  %v4407_v45 = vld [vmem:[#allocation89_spill] sm:$0xff] }
 0x568   : > { %v2322_v6 = vadd.f32 %v2054_v5, %v1757_v47  ;;  %v2323_v36 = vadd.f32 %v2203_v20, %v1906_v53 }
 0x56a   : > { %2435 = vst [vmem:[%s3170_s26 + $0x2b0] sm:$0xff] %v2322_v6  ;;  %v4408_v6 = vld [vmem:[#allocation92_spill] sm:$0xff] }
 0x56b   : > { %2436 = vst.msk [vmem:[%s3170_s26 + $0x2b8] sm:$0xff] %vm2349_vm1, %v2323_v36 }
 0x56d   : > { %v1759_v55 = vpop.f32.mrf.mxu2  ;;  %v1908_v58 = vpop.f32.mrf.mxu3 }
 0x56e   : > { %v1760_v7 = vadd.f32 %v1759_v55, %v4396_v0  ;;  %v1909_v54 = vadd.f32 %v1908_v58, %v4397_v62  ;;  %v2059_v1 = vpop.f32.mrf.mxu0  ;;  %v2208_v18 = vpop.f32.mrf.mxu1  ;;  %v4409_v55 = vld [vmem:[#allocation93_spill] sm:$0xff] }
 0x570   : > { %v2324_v59 = vadd.f32 %v2057_v43, %v1760_v7  ;;  %v2325_v34 = vadd.f32 %v2206_v25, %v1909_v54 }
 0x572   : > { %2437 = vst [vmem:[%s3170_s26 + $0x2c0] sm:$0xff] %v2324_v59  ;;  %v4410_v59 = vld [vmem:[#allocation94_spill] sm:$0xff] }
 0x573   : > { %2438 = vst.msk [vmem:[%s3170_s26 + $0x2c8] sm:$0xff] %vm2349_vm1, %v2325_v34 }
 0x575   : > { %v1761_v26 = vpop.f32.mrf.mxu2  ;;  %v1910_v31 = vpop.f32.mrf.mxu3 }
 0x576   : > { %v1762_v42 = vadd.f32 %v1761_v26, %v4398_v57  ;;  %v1911_v2 = vadd.f32 %v1910_v31, %v4399_v33  ;;  %v2062_v16 = vpop.f32.mrf.mxu0  ;;  %v2211_v40 = vpop.f32.mrf.mxu1  ;;  %v4411_v26 = vld [vmem:[#allocation95_spill] sm:$0xff] }
 0x578   : > { %v2326_v21 = vadd.f32 %v2059_v1, %v1762_v42  ;;  %v2327_v24 = vadd.f32 %v2208_v18, %v1911_v2 }
 0x57a   : > { %2439 = vst [vmem:[%s3170_s26 + $0x2d0] sm:$0xff] %v2326_v21  ;;  %v4412_v21 = vld [vmem:[#allocation98_spill] sm:$0xff] }
 0x57b   : > { %2440 = vst.msk [vmem:[%s3170_s26 + $0x2d8] sm:$0xff] %vm2349_vm1, %v2327_v24 }
 0x57d   : > { %v1764_v50 = vpop.f32.mrf.mxu2  ;;  %v1913_v46 = vpop.f32.mrf.mxu3 }
 0x57e   : > { %v1765_v63 = vadd.f32 %v1764_v50, %v4400_v49  ;;  %v1914_v14 = vadd.f32 %v1913_v46, %v4401_v38  ;;  %v2064_v15 = vpop.f32.mrf.mxu0  ;;  %v2213_v51 = vpop.f32.mrf.mxu1  ;;  %v4413_v50 = vld [vmem:[#allocation99_spill] sm:$0xff] }
 0x580   : > { %v2328_v32 = vadd.f32 %v2062_v16, %v1765_v63  ;;  %v2329_v29 = vadd.f32 %v2211_v40, %v1914_v14 }
 0x582   : > { %2441 = vst [vmem:[%s3170_s26 + $0x2e0] sm:$0xff] %v2328_v32  ;;  %v4414_v32 = vld [vmem:[#allocation101_spill] sm:$0xff] }
 0x583   : > { %2442 = vst.msk [vmem:[%s3170_s26 + $0x2e8] sm:$0xff] %vm2349_vm1, %v2329_v29 }
 0x585   : > { %v1766_v17 = vpop.f32.mrf.mxu2  ;;  %v1915_v48 = vpop.f32.mrf.mxu3 }
 0x586   : > { %v1767_v9 = vadd.f32 %v1766_v17, %v4402_v3  ;;  %v1916_v11 = vadd.f32 %v1915_v48, %v4403_v39  ;;  %v2067_v60 = vpop.f32.mrf.mxu0  ;;  %v2216_v52 = vpop.f32.mrf.mxu1  ;;  %v4415_v17 = vld [vmem:[#allocation102_spill] sm:$0xff] }
 0x588   : > { %v2330_v41 = vadd.f32 %v2064_v15, %v1767_v9  ;;  %v2331_v35 = vadd.f32 %v2213_v51, %v1916_v11 }
 0x58a   : > { %2443 = vst [vmem:[%s3170_s26 + $0x2f0] sm:$0xff] %v2330_v41  ;;  %v4416_v41 = vld [vmem:[#allocation105_spill] sm:$0xff] }
 0x58b   : > { %2444 = vst.msk [vmem:[%s3170_s26 + $0x2f8] sm:$0xff] %vm2349_vm1, %v2331_v35 }
 0x58d   : > { %v1769_v44 = vpop.f32.mrf.mxu2  ;;  %v1918_v23 = vpop.f32.mrf.mxu3 }
 0x58e   : > { %v1770_v4 = vadd.f32 %v1769_v44, %v4404_v28  ;;  %v1919_v30 = vadd.f32 %v1918_v23, %v4405_v61  ;;  %v2069_v10 = vpop.f32.mrf.mxu0  ;;  %v2218_v56 = vpop.f32.mrf.mxu1  ;;  %v4417_v44 = vld [vmem:[#allocation106_spill] sm:$0xff] }
 0x590   : > { %v2332_v12 = vadd.f32 %v2067_v60, %v1770_v4  ;;  %v2333_v19 = vadd.f32 %v2216_v52, %v1919_v30  ;;  %v4418_v30 = vld [vmem:[#allocation109_spill] sm:$0xff] }
 0x592   : > { %2445 = vst [vmem:[%s3170_s26 + $0x300] sm:$0xff] %v2332_v12 }
 0x593   : > { %2446 = vst.msk [vmem:[%s3170_s26 + $0x308] sm:$0xff] %vm2349_vm1, %v2333_v19  ;;  %v4419_v19 = vld [vmem:[#allocation110_spill] sm:$0xff] }
 0x595   : > { %v1771_v5 = vpop.f32.mrf.mxu2  ;;  %v1920_v13 = vpop.f32.mrf.mxu3 }
 0x596   : > { %v1772_v20 = vadd.f32 %v1771_v5, %v4406_v8  ;;  %v1921_v27 = vadd.f32 %v1920_v13, %v4407_v45  ;;  %v2072_v47 = vpop.f32.mrf.mxu0  ;;  %v2221_v37 = vpop.f32.mrf.mxu1 }
 0x598   : > { %v2334_v22 = vadd.f32 %v2069_v10, %v1772_v20  ;;  %v2335_v53 = vadd.f32 %v2218_v56, %v1921_v27 }
 0x59a   : > { %2447 = vst [vmem:[%s3170_s26 + $0x310] sm:$0xff] %v2334_v22 }
 0x59b   : > { %2448 = vst.msk [vmem:[%s3170_s26 + $0x318] sm:$0xff] %vm2349_vm1, %v2335_v53 }
 0x59d   : > { %v1774_v43 = vpop.f32.mrf.mxu2  ;;  %v1923_v36 = vpop.f32.mrf.mxu3 }
 0x59e   : > { %v1775_v25 = vadd.f32 %v1774_v43, %v4408_v6  ;;  %v1924_v0 = vadd.f32 %v1923_v36, %v4409_v55  ;;  %v2074_v7 = vpop.f32.mrf.mxu0  ;;  %v2223_v62 = vpop.f32.mrf.mxu1 }
 0x5a0   : > { %v2336_v58 = vadd.f32 %v2072_v47, %v1775_v25  ;;  %v2337_v54 = vadd.f32 %v2221_v37, %v1924_v0 }
 0x5a2   : > { %2449 = vst [vmem:[%s3170_s26 + $0x320] sm:$0xff] %v2336_v58 }
 0x5a3   : > { %2450 = vst.msk [vmem:[%s3170_s26 + $0x328] sm:$0xff] %vm2349_vm1, %v2337_v54 }
 0x5a5   : > { %v1776_v1 = vpop.f32.mrf.mxu2  ;;  %v1925_v34 = vpop.f32.mrf.mxu3 }
 0x5a6   : > { %v1777_v18 = vadd.f32 %v1776_v1, %v4410_v59  ;;  %v1926_v57 = vadd.f32 %v1925_v34, %v4411_v26  ;;  %v2077_v33 = vpop.f32.mrf.mxu0  ;;  %v2226_v2 = vpop.f32.mrf.mxu1 }
 0x5a8   : > { %v2338_v42 = vadd.f32 %v2074_v7, %v1777_v18  ;;  %v2339_v31 = vadd.f32 %v2223_v62, %v1926_v57 }
 0x5aa   : > { %2451 = vst [vmem:[%s3170_s26 + $0x330] sm:$0xff] %v2338_v42 }
 0x5ab   : > { %2452 = vst.msk [vmem:[%s3170_s26 + $0x338] sm:$0xff] %vm2349_vm1, %v2339_v31 }
 0x5ad   : > { %v1779_v16 = vpop.f32.mrf.mxu2  ;;  %v1928_v24 = vpop.f32.mrf.mxu3 }
 0x5ae   : > { %v1780_v40 = vadd.f32 %v1779_v16, %v4412_v21  ;;  %v1929_v49 = vadd.f32 %v1928_v24, %v4413_v50  ;;  %v2079_v38 = vpop.f32.mrf.mxu0  ;;  %v2228_v14 = vpop.f32.mrf.mxu1 }
 0x5b0   : > { %v2340_v63 = vadd.f32 %v2077_v33, %v1780_v40  ;;  %v2341_v46 = vadd.f32 %v2226_v2, %v1929_v49 }
 0x5b2   : > { %2453 = vst [vmem:[%s3170_s26 + $0x340] sm:$0xff] %v2340_v63 }
 0x5b3   : > { %2454 = vst.msk [vmem:[%s3170_s26 + $0x348] sm:$0xff] %vm2349_vm1, %v2341_v46 }
 0x5b5   : > { %v1781_v15 = vpop.f32.mrf.mxu2  ;;  %v1930_v29 = vpop.f32.mrf.mxu3 }
 0x5b6   : > { %v1782_v51 = vadd.f32 %v1781_v15, %v4414_v32  ;;  %v1931_v3 = vadd.f32 %v1930_v29, %v4415_v17  ;;  %v2082_v39 = vpop.f32.mrf.mxu0  ;;  %v2231_v60 = vpop.f32.mrf.mxu1 }
 0x5b8   : > { %v2342_v9 = vadd.f32 %v2079_v38, %v1782_v51  ;;  %v2343_v48 = vadd.f32 %v2228_v14, %v1931_v3 }
 0x5ba   : > { %2455 = vst [vmem:[%s3170_s26 + $0x350] sm:$0xff] %v2342_v9 }
 0x5bb   : > { %2456 = vst.msk [vmem:[%s3170_s26 + $0x358] sm:$0xff] %vm2349_vm1, %v2343_v48 }
 0x5bd   : > { %v1784_v11 = vpop.f32.mrf.mxu2  ;;  %v1933_v35 = vpop.f32.mrf.mxu3 }
 0x5be   : > { %v1785_v52 = vadd.f32 %v1784_v11, %v4416_v41  ;;  %v1934_v28 = vadd.f32 %v1933_v35, %v4417_v44  ;;  %v2084_v56 = vpop.f32.mrf.mxu0  ;;  %v2233_v8 = vpop.f32.mrf.mxu1 }
 0x5c0   : > { %v2344_v4 = vadd.f32 %v2082_v39, %v1785_v52  ;;  %v2345_v23 = vadd.f32 %v2231_v60, %v1934_v28 }
 0x5c2   : > { %2457 = vst [vmem:[%s3170_s26 + $0x360] sm:$0xff] %v2344_v4 }
 0x5c3   : > { %2458 = vst.msk [vmem:[%s3170_s26 + $0x368] sm:$0xff] %vm2349_vm1, %v2345_v23 }
 0x5c5   : > { %v1786_v61 = vpop.f32.mrf.mxu2  ;;  %v1935_v12 = vpop.f32.mrf.mxu3 }
 0x5c6   : > { %v1787_v10 = vadd.f32 %v1786_v61, %v4418_v30  ;;  %v1936_v5 = vadd.f32 %v1935_v12, %v4419_v19 }
 0x5c8   : > { %v2346_v20 = vadd.f32 %v2084_v56, %v1787_v10  ;;  %v2347_v13 = vadd.f32 %v2233_v8, %v1936_v5 }
 0x5ca   : > { %2459 = vst [vmem:[%s3170_s26 + $0x370] sm:$0xff] %v2346_v20 }
 0x5cb   : > { %2460 = vst.msk [vmem:[%s3170_s26 + $0x378] sm:$0xff] %vm2349_vm1, %v2347_v13 }
 0x5cc   : > { %2971 = shalt.err (!%p2968_p11)
}
 0x5cd   : > { %s3030_s22 = smov 256   ;;  %s3031_s26 = smov 16  }
 0x5ce   : > { %2782 = dma.vmem_to_hbm [thread:$0]  (%p3117_p0), %s2476_s20, 14336, %s2478_s11, %s2462_s16, %s3030_s22, %s3030_s22, %s3031_s26  }
 0x5cf PF: > { %p2804_p12 = scmp.ge.s32.totalorder %s3018_s15, 2  ;;  %s2492_s28 = sand.u32 1, %s3006_s12  }
 0x5d0   : > { %s2493_s29 = scalar_lea.sflag [#allocation5], %s2492_s28 }
 0x5d1   : > { %p2796_p13 = pnand %p2804_p12, %p3087_p6 }
 0x5d3   : > { %p2797_p3 = pneg %p2796_p13 }
 0x5d5   : > { %3001 = dma.done.wait (%p2797_p3), %s2493_s29, 14336  }
 0x5d6   : > { %3003 = vsyncadd (%p2797_p3), %s2493_s29, 4294952960  ;;  %p17_p5 = scmp.ge.s32.totalorder %s3107_s6, 6   ;;  %s4420_s12 = smov %s3010_s13 }
 0x5d7   : > { %s4421_s13 = smov %s3014_s14  ;;  %s4422_s14 = smov %s3123_s10 }
 0x5d8   : > { %s4423_s15 = smov %s3107_s6  ;;  %19 = sbr.rel (!%p17_p5) target bundleno = 6 (0x6), region = 105 }
 0x5dd   :  { %2499 = vsyncpa [#allocation4], 1 }
 0x5de   :  { %2501 = vsyncpa [#allocation4 + $0x1], 1 }
 0x5df   :  { %2502 = vsyncpa [#allocation7], 1 }
 0x5e0   :  { %2503 = vsyncpa [#allocation5], 1 }
 0x5e1   :  { %2505 = vsyncpa [#allocation5 + $0x1], 1 }

</bundles_post_ra>
